<compile_context>
chip_gen: v6e
topology: v6e:2x2x1
jax: 0.10.0
libtpu: 0.0.40
codegen_flags: <defaults>
</compile_context>

<pallas_src>
import math
import functools

import jax
import jax.numpy as jnp
import numpy as np
from jax import lax
from jax.experimental import pallas as pl
from jax.experimental.pallas import tpu as pltpu


# ----------------------------- Pallas kernel -------------------------------


def _cross_attn_kernel(
    tgt_ref,    # (tq*N, D) f32   query-tile of tgt (also the residual), rows = [l, n]
    qpos_ref,   # (tq*N, D) f32   query positional embedding tile
    mem_ref,    # (S*N,  D) f32   full memory (resident across grid steps)
    pos_ref,    # (S*N,  D) f32   full key positional embedding
    w_ref,      # (4, D, D) mxu   [Wq^T, Wk^T, Wv^T, Wo^T]  (y = x @ W^T)
    vec_ref,    # (6, D)    f32   [bq, bk, bv, bo, ln_gamma, ln_beta]
    out_ref,    # (tq*N, D) f32
    *,
    nbatch: int,
    nhead: int,
    mxu_dtype,
):
    f32 = jnp.float32
    Rq, D = tgt_ref.shape
    Rk = mem_ref.shape[0]
    N, H = nbatch, nhead
    tq, S = Rq // N, Rk // N
    hd = D // H
    scale = 1.0 / math.sqrt(hd)

    # ---- hoisted parameter loads (constant index maps -> VMEM resident) ----
    wq, wk, wv, wo = w_ref[0], w_ref[1], w_ref[2], w_ref[3]
    vec = vec_ref[...]                                   # (6, D) f32
    bq, bk, bv, bo, gamma, beta = (vec[i] for i in range(6))

    # ---- fused positional-embedding adds (VPU, f32) ------------------------
    tgt = tgt_ref[...]                                   # (tq*N, D)
    q_in = tgt + qpos_ref[...]                           # tgt + query_pos
    mem = mem_ref[...]                                   # (S*N, D)
    k_in = mem + pos_ref[...]                            # memory + pos

    # ---- input projections: single matmuls on the whole flattened slabs ----
    q = jnp.dot(q_in.astype(mxu_dtype), wq, preferred_element_type=f32) + bq
    k = jnp.dot(k_in.astype(mxu_dtype), wk, preferred_element_type=f32) + bk
    v = jnp.dot(mem.astype(mxu_dtype), wv, preferred_element_type=f32) + bv

    # ---- (rows, D) -> (N*H, T, hd): one relayout per tile (not per batch) --
    def to_heads(x, T):
        return (x.reshape(T, N, H, hd)
                 .transpose(1, 2, 0, 3)
                 .reshape(N * H, T, hd)
                 .astype(mxu_dtype))

    qh = to_heads(q, tq)                                 # (N*H, tq, hd)
    kh = to_heads(k, S)                                  # (N*H, S,  hd)
    vh = to_heads(v, S)                                  # (N*H, S,  hd)

    # ---- scores + numerically-stable exact softmax (f32 on VPU/EUP) --------
    s = jnp.einsum("bqd,bkd->bqk", qh, kh,
                   preferred_element_type=f32) * scale   # (N*H, tq, S)
    s = s - jnp.max(s, axis=-1, keepdims=True)
    p = jnp.exp(s)
    p = p / jnp.sum(p, axis=-1, keepdims=True)           # exact divide (no approx)

    # ---- attention context + output projection -----------------------------
    ctx = jnp.einsum("bqk,bkd->bqd", p.astype(mxu_dtype), vh,
                     preferred_element_type=f32)          # (N*H, tq, hd)
    ctx = (ctx.reshape(N, H, tq, hd)
              .transpose(2, 0, 1, 3)
              .reshape(Rq, D))                            # back to rows = [l, n]
    attn = jnp.dot(ctx.astype(mxu_dtype), wo,
                   preferred_element_type=f32) + bo       # (tq*N, D)

    # ---- residual add + LayerNorm(eps=1e-5), all f32 ------------------------
    resid = tgt + attn
    mean = jnp.mean(resid, axis=-1, keepdims=True)
    cen = resid - mean
    var = jnp.mean(cen * cen, axis=-1, keepdims=True)
    out = cen * lax.rsqrt(var + 1e-5) * gamma + beta
    out_ref[...] = out.astype(out_ref.dtype)


# ------------------------------- wrapper ------------------------------------


def cross_attention_layer(
    tgt,          # (L, N, D)  -- PyTorch (seq, batch, embed) layout
    memory,       # (S, N, D)
    params,       # dict: in_proj_weight (3D, D), in_proj_bias (3D,),
                  #       out_proj_w (D, D), out_proj_b (D,),
                  #       ln_gamma (D,), ln_beta (D,)
    nhead,
    pos=None,          # (S, N, D) or None
    query_pos=None,    # (L, N, D) or None
    *,
    q_block=None,
    matmul_dtype=None,   # MXU operand dtype; None = f32 (jnp.bfloat16 for scaled v6e/v7x)
):
    L, N, D = tgt.shape
    S = memory.shape[0]
    assert D % nhead == 0

    if query_pos is None:
        query_pos = jnp.zeros_like(tgt)
    if pos is None:
        pos = jnp.zeros_like(memory)

    # Grid: collapse to a single step unless per-step work clearly exceeds the
    # ~0.35us grid-step overhead (v5e/v6e single-TC; megacore split only pays
    # off on v7x once the kernel is scaled up).
    if q_block is None:
        approx_flops = 2 * L * N * D * (2 * S + 2 * D)
        if approx_flops < (1 << 24):
            q_block = L
        else:
            q_block = min(L, 256)
            while q_block > 1 and (L % q_block or (q_block * N) % 8):
                q_block -= 1
            if L % q_block or (q_block * N) % 8:
                q_block = L
    assert L % q_block == 0
    grid = (L // q_block,)

    md = jnp.dtype(matmul_dtype) if matmul_dtype is not None else jnp.dtype(jnp.float32)

    # Pack weights once: (4, D, D) with y = x @ W^T convention.
    w = params["in_proj_weight"]                 # (3D, D)
    wmats = jnp.stack([
        w[0 * D:1 * D].T,
        w[1 * D:2 * D].T,
        w[2 * D:3 * D].T,
        params["out_proj_w"].T,
    ]).astype(md)                                # (4, D, D)

    b = params["in_proj_bias"]
    vecs = jnp.stack([
        b[0 * D:1 * D], b[1 * D:2 * D], b[2 * D:3 * D],
        params["out_proj_b"], params["ln_gamma"], params["ln_beta"],
    ]).astype(jnp.float32)                       # (6, D)

    # Free, contiguous reshapes (no transposes): kernel works on (rows, D) slabs.
    tgt2 = tgt.reshape(L * N, D)
    qpos2 = query_pos.reshape(L * N, D)
    mem2 = memory.reshape(S * N, D)
    pos2 = pos.reshape(S * N, D)

    q_spec = pl.BlockSpec((q_block * N, D), lambda i: (i, 0))
    kv_spec = pl.BlockSpec((S * N, D), lambda i: (0, 0))         # resident
    w_spec = pl.BlockSpec(wmats.shape, lambda i: (0, 0, 0))      # resident
    vec_spec = pl.BlockSpec(vecs.shape, lambda i: (0, 0))        # resident

    # Conservative single-shot VMEM budget (see TODO(synk) at top of file).
    working_set = (
        2 * 4 * (3 * q_block * N * D)            # tgt/qpos/out tiles, dbl-buffered
        + 2 * 4 * (2 * S * N * D)                # memory/pos residents, dbl-buffered
        + 2 * (wmats.size * wmats.dtype.itemsize + vecs.size * 4)
    )
    assert working_set < 24 * 1024 * 1024, (
        "working set too large for the single-shot kernel; needs S-tiled "
        "online-softmax inner pipeline (see TODO(synk))")

    out = pl.pallas_call(
        functools.partial(_cross_attn_kernel, nbatch=N, nhead=nhead,
                          mxu_dtype=md),
        out_shape=jax.ShapeDtypeStruct((L * N, D), tgt.dtype),
        grid_spec=pltpu.PrefetchScalarGridSpec(
            num_scalar_prefetch=0,
            grid=grid,
            in_specs=[q_spec, q_spec, kv_spec, kv_spec, w_spec, vec_spec],
            out_specs=q_spec,
        ),
        compiler_params=pltpu.CompilerParams(
            dimension_semantics=("parallel",)),
    )(tgt2, qpos2, mem2, pos2, wmats, vecs)
    return out.reshape(L, N, D)


# --------------------------- pure-JAX reference -----------------------------


def cross_attention_ref(tgt, memory, params, nhead, pos=None, query_pos=None,
                        matmul_dtype=None):
    """Reference. matmul_dtype=None -> pure f32; jnp.bfloat16 mirrors the
    kernel's bf16 MXU operand casts (f32 accumulation)."""
    L, N, D = tgt.shape
    hd = D // nhead
    f32 = jnp.float32
    md = jnp.dtype(matmul_dtype) if matmul_dtype is not None else jnp.dtype(f32)

    q_in = tgt if query_pos is None else tgt + query_pos
    k_in = memory if pos is None else memory + pos

    w = params["in_proj_weight"]
    b = params["in_proj_bias"]

    def proj(x, wp, bp):
        return jnp.einsum("tnd,ed->tne", x.astype(md), wp.astype(md),
                          preferred_element_type=f32) + bp

    q = proj(q_in, w[:D], b[:D])
    k = proj(k_in, w[D:2 * D], b[D:2 * D])
    v = proj(memory, w[2 * D:], b[2 * D:])

    def split(x):  # (T, N, D) -> (N, H, T, hd)
        T = x.shape[0]
        return jnp.transpose(x.reshape(T, N, nhead, hd), (1, 2, 0, 3))

    qh, kh, vh = split(q), split(k), split(v)
    s = jnp.einsum("nhld,nhsd->nhls", qh.astype(md), kh.astype(md),
                   preferred_element_type=f32) / math.sqrt(hd)
    p = jax.nn.softmax(s, axis=-1)
    ctx = jnp.einsum("nhls,nhsd->nhld", p.astype(md), vh.astype(md),
                     preferred_element_type=f32)                  # (N,H,L,hd)
    ctx = jnp.transpose(ctx, (2, 0, 1, 3)).reshape(L, N, D)
    attn_out = jnp.einsum("lnd,ed->lne", ctx.astype(md),
                          params["out_proj_w"].astype(md),
                          preferred_element_type=f32) + params["out_proj_b"]

    resid = tgt + attn_out
    mean = jnp.mean(resid, axis=-1, keepdims=True)
    var = jnp.mean((resid - mean) ** 2, axis=-1, keepdims=True)
    normed = (resid - mean) / jnp.sqrt(var + 1e-5)
    return normed * params["ln_gamma"] + params["ln_beta"]


# --------------------------------- main --------------------------------------


def _xavier_uniform(key, shape):
    fan_out, fan_in = shape
    bound = math.sqrt(6.0 / (fan_in + fan_out))
    return jax.random.uniform(key, shape, jnp.float32, -bound, bound)


if __name__ == "__main__":
    d_model, nhead = 32, 4
    L, S, N = 8, 16, 2

    key = jax.random.PRNGKey(0)
    keys = jax.random.split(key, 6)

    # Deterministic synthetic parameters (matches module __init__ shapes).
    params = {
        "in_proj_weight": _xavier_uniform(keys[0], (3 * d_model, d_model)),
        "in_proj_bias": jnp.zeros((3 * d_model,), jnp.float32),
        "out_proj_w": _xavier_uniform(keys[1], (d_model, d_model)),
        "out_proj_b": jnp.zeros((d_model,), jnp.float32),
        "ln_gamma": jnp.ones((d_model,), jnp.float32),
        "ln_beta": jnp.zeros((d_model,), jnp.float32),
    }

    tgt = jax.random.normal(keys[2], (L, N, d_model), jnp.float32)
    memory = jax.random.normal(keys[3], (S, N, d_model), jnp.float32)
    pos = jax.random.normal(keys[4], (S, N, d_model), jnp.float32)
    query_pos = jax.random.normal(keys[5], (L, N, d_model), jnp.float32)

    # Default (f32 MXU operand) path -- matches the module's f32 math.
    layer_f32 = jax.jit(functools.partial(cross_attention_layer, nhead=nhead))
    out_f32 = layer_f32(tgt, memory, params, pos=pos, query_pos=query_pos)
    out_f32 = jax.block_until_ready(out_f32)

    ref_f32 = cross_attention_ref(tgt, memory, params, nhead,
                                  pos=pos, query_pos=query_pos)
    # Semantic check vs the module's f32 math. Tolerance absorbs possible
    # default-precision f32-matmul differences between the Mosaic kernel and
    # the XLA reference on real TPUs; matched-precision runs agree to ~1e-6.
    np.testing.assert_allclose(np.asarray(out_f32), np.asarray(ref_f32),
                               rtol=2e-2, atol=2e-2)

    # Reduced-precision (bf16 MXU operands, f32 accumulation) path: tight check
    # against a reference that mirrors the same operand casts, validating the
    # kernel math itself (exact softmax -> no approx-reciprocal slack needed).
    layer_bf16 = jax.jit(functools.partial(cross_attention_layer, nhead=nhead,
                                           matmul_dtype=jnp.bfloat16))
    out_bf16 = layer_bf16(tgt, memory, params, pos=pos, query_pos=query_pos)
    out_bf16 = jax.block_until_ready(out_bf16)

    ref_bf16 = cross_attention_ref(tgt, memory, params, nhead,
                                   pos=pos, query_pos=query_pos,
                                   matmul_dtype=jnp.bfloat16)
    np.testing.assert_allclose(np.asarray(out_bf16), np.asarray(ref_bf16),
                               rtol=2e-3, atol=2e-3)

    print("KERNEL_OK")
</pallas_src>

<mosaic_0001>
module attributes {stable_mosaic.version = 11 : i64} {
  func.func @_cross_attn_kernel(%arg0: i32, %arg1: memref<16x32xf32, #tpu.memory_space<vmem>>, %arg2: memref<16x32xf32, #tpu.memory_space<vmem>>, %arg3: memref<32x32xf32, #tpu.memory_space<vmem>>, %arg4: memref<32x32xf32, #tpu.memory_space<vmem>>, %arg5: memref<4x32x32xf32, #tpu.memory_space<vmem>>, %arg6: memref<6x32xf32, #tpu.memory_space<vmem>>, %arg7: memref<16x32xf32, #tpu.memory_space<vmem>>) attributes {dimension_semantics = [#tpu.dimension_semantics<parallel>], iteration_bounds = array<i64: 1>, scalar_prefetch = 0 : i64, scratch_operands = 0 : i64, tpu.core_type = #tpu.core_type<tc>, window_params = [{transform_indices = @transform_0, window_bounds = array<i64: 16, 32>}, {transform_indices = @transform_1, window_bounds = array<i64: 16, 32>}, {pipeline_mode = #tpu.pipeline_mode<synchronous>, transform_indices = @transform_2, window_bounds = array<i64: 32, 32>}, {pipeline_mode = #tpu.pipeline_mode<synchronous>, transform_indices = @transform_3, window_bounds = array<i64: 32, 32>}, {pipeline_mode = #tpu.pipeline_mode<synchronous>, transform_indices = @transform_4, window_bounds = array<i64: 4, 32, 32>}, {pipeline_mode = #tpu.pipeline_mode<synchronous>, transform_indices = @transform_5, window_bounds = array<i64: 6, 32>}, {transform_indices = @transform_6, window_bounds = array<i64: 16, 32>}]} {
    %c0 = arith.constant 0 : index
    %c0_0 = arith.constant 0 : index
    %c0_1 = arith.constant 0 : index
    %0 = vector.load %arg5[%c0, %c0_0, %c0_1] : memref<4x32x32xf32, #tpu.memory_space<vmem>>, vector<1x32x32xf32>
    %1 = vector.shape_cast %0 : vector<1x32x32xf32> to vector<32x32xf32>
    %c1 = arith.constant 1 : index
    %c0_2 = arith.constant 0 : index
    %c0_3 = arith.constant 0 : index
    %2 = vector.load %arg5[%c1, %c0_2, %c0_3] : memref<4x32x32xf32, #tpu.memory_space<vmem>>, vector<1x32x32xf32>
    %3 = vector.shape_cast %2 : vector<1x32x32xf32> to vector<32x32xf32>
    %c2 = arith.constant 2 : index
    %c0_4 = arith.constant 0 : index
    %c0_5 = arith.constant 0 : index
    %4 = vector.load %arg5[%c2, %c0_4, %c0_5] : memref<4x32x32xf32, #tpu.memory_space<vmem>>, vector<1x32x32xf32>
    %5 = vector.shape_cast %4 : vector<1x32x32xf32> to vector<32x32xf32>
    %c3 = arith.constant 3 : index
    %c0_6 = arith.constant 0 : index
    %c0_7 = arith.constant 0 : index
    %6 = vector.load %arg5[%c3, %c0_6, %c0_7] : memref<4x32x32xf32, #tpu.memory_space<vmem>>, vector<1x32x32xf32>
    %7 = vector.shape_cast %6 : vector<1x32x32xf32> to vector<32x32xf32>
    %c0_8 = arith.constant 0 : index
    %c0_9 = arith.constant 0 : index
    %8 = vector.load %arg6[%c0_8, %c0_9] : memref<6x32xf32, #tpu.memory_space<vmem>>, vector<6x32xf32>
    %9 = vector.extract_strided_slice %8 {offsets = [0, 0], sizes = [1, 32], strides = [1, 1]} : vector<6x32xf32> to vector<1x32xf32>
    %10 = vector.shape_cast %9 : vector<1x32xf32> to vector<32xf32>
    %11 = vector.extract_strided_slice %8 {offsets = [1, 0], sizes = [1, 32], strides = [1, 1]} : vector<6x32xf32> to vector<1x32xf32>
    %12 = vector.shape_cast %11 : vector<1x32xf32> to vector<32xf32>
    %13 = vector.extract_strided_slice %8 {offsets = [2, 0], sizes = [1, 32], strides = [1, 1]} : vector<6x32xf32> to vector<1x32xf32>
    %14 = vector.shape_cast %13 : vector<1x32xf32> to vector<32xf32>
    %15 = vector.extract_strided_slice %8 {offsets = [3, 0], sizes = [1, 32], strides = [1, 1]} : vector<6x32xf32> to vector<1x32xf32>
    %16 = vector.shape_cast %15 : vector<1x32xf32> to vector<32xf32>
    %17 = vector.extract_strided_slice %8 {offsets = [4, 0], sizes = [1, 32], strides = [1, 1]} : vector<6x32xf32> to vector<1x32xf32>
    %18 = vector.shape_cast %17 : vector<1x32xf32> to vector<32xf32>
    %19 = vector.extract_strided_slice %8 {offsets = [5, 0], sizes = [1, 32], strides = [1, 1]} : vector<6x32xf32> to vector<1x32xf32>
    %20 = vector.shape_cast %19 : vector<1x32xf32> to vector<32xf32>
    %c0_10 = arith.constant 0 : index
    %c0_11 = arith.constant 0 : index
    %21 = vector.load %arg1[%c0_10, %c0_11] : memref<16x32xf32, #tpu.memory_space<vmem>>, vector<16x32xf32>
    %c0_12 = arith.constant 0 : index
    %c0_13 = arith.constant 0 : index
    %22 = vector.load %arg2[%c0_12, %c0_13] : memref<16x32xf32, #tpu.memory_space<vmem>>, vector<16x32xf32>
    %23 = arith.addf %21, %22 : vector<16x32xf32>
    %c0_14 = arith.constant 0 : index
    %c0_15 = arith.constant 0 : index
    %24 = vector.load %arg3[%c0_14, %c0_15] : memref<32x32xf32, #tpu.memory_space<vmem>>, vector<32x32xf32>
    %c0_16 = arith.constant 0 : index
    %c0_17 = arith.constant 0 : index
    %25 = vector.load %arg4[%c0_16, %c0_17] : memref<32x32xf32, #tpu.memory_space<vmem>>, vector<32x32xf32>
    %26 = arith.addf %24, %25 : vector<32x32xf32>
    %cst = arith.constant dense<0.000000e+00> : vector<16x32xf32>
    %27 = tpu.matmul %23, %1, %cst {dimension_numbers = #tpu.dot_dimension_numbers<[1], [0], [0], [1], [0, 0, 1, 1], [], []>} : vector<16x32xf32>, vector<32x32xf32>, vector<16x32xf32> -> vector<16x32xf32>
    %28 = vector.shape_cast %10 : vector<32xf32> to vector<1x32xf32>
    %29 = vector.broadcast %28 : vector<1x32xf32> to vector<16x32xf32>
    %30 = arith.addf %27, %29 : vector<16x32xf32>
    %cst_18 = arith.constant dense<0.000000e+00> : vector<32x32xf32>
    %31 = tpu.matmul %26, %3, %cst_18 {dimension_numbers = #tpu.dot_dimension_numbers<[1], [0], [0], [1], [0, 0, 1, 1], [], []>} : vector<32x32xf32>, vector<32x32xf32>, vector<32x32xf32> -> vector<32x32xf32>
    %32 = vector.shape_cast %12 : vector<32xf32> to vector<1x32xf32>
    %33 = vector.broadcast %32 : vector<1x32xf32> to vector<32x32xf32>
    %34 = arith.addf %31, %33 : vector<32x32xf32>
    %cst_19 = arith.constant dense<0.000000e+00> : vector<32x32xf32>
    %35 = tpu.matmul %24, %5, %cst_19 {dimension_numbers = #tpu.dot_dimension_numbers<[1], [0], [0], [1], [0, 0, 1, 1], [], []>} : vector<32x32xf32>, vector<32x32xf32>, vector<32x32xf32> -> vector<32x32xf32>
    %36 = vector.shape_cast %14 : vector<32xf32> to vector<1x32xf32>
    %37 = vector.broadcast %36 : vector<1x32xf32> to vector<32x32xf32>
    %38 = arith.addf %35, %37 : vector<32x32xf32>
    %39 = vector.shape_cast %30 : vector<16x32xf32> to vector<8x2x4x8xf32>
    %40 = tpu.transpose %39, [1, 2, 0, 3] : vector<8x2x4x8xf32> -> vector<2x4x8x8xf32>
    %41 = vector.shape_cast %40 : vector<2x4x8x8xf32> to vector<8x8x8xf32>
    %42 = vector.shape_cast %34 : vector<32x32xf32> to vector<16x2x4x8xf32>
    %43 = tpu.transpose %42, [1, 2, 0, 3] : vector<16x2x4x8xf32> -> vector<2x4x16x8xf32>
    %44 = vector.shape_cast %43 : vector<2x4x16x8xf32> to vector<8x16x8xf32>
    %45 = vector.shape_cast %38 : vector<32x32xf32> to vector<16x2x4x8xf32>
    %46 = tpu.transpose %45, [1, 2, 0, 3] : vector<16x2x4x8xf32> -> vector<2x4x16x8xf32>
    %47 = vector.shape_cast %46 : vector<2x4x16x8xf32> to vector<8x16x8xf32>
    "tpu.trace_start"() <{level = 10 : i32, message = "bqd,bkd->bqk"}> : () -> ()
    %cst_20 = arith.constant dense<0.000000e+00> : vector<8x8x16xf32>
    %48 = tpu.matmul %41, %44, %cst_20 {dimension_numbers = #tpu.dot_dimension_numbers<[2], [2], [1], [1], [0, 0, 0, 1, 1, 1], [0], [0]>} : vector<8x8x8xf32>, vector<8x16x8xf32>, vector<8x8x16xf32> -> vector<8x8x16xf32>
    "tpu.trace_stop"() : () -> ()
    %cst_21 = arith.constant 0.353553385 : f32
    %49 = vector.broadcast %cst_21 : f32 to vector<8x8x16xf32>
    %50 = arith.mulf %48, %49 : vector<8x8x16xf32>
    %cst_22 = arith.constant dense<0xFF800000> : vector<8x8xf32>
    %51 = vector.multi_reduction <maximumf>, %50, %cst_22 [2] : vector<8x8x16xf32> to vector<8x8xf32>
    %52 = vector.shape_cast %51 : vector<8x8xf32> to vector<8x8x1xf32>
    %53 = vector.broadcast %52 : vector<8x8x1xf32> to vector<8x8x16xf32>
    %54 = arith.subf %50, %53 : vector<8x8x16xf32>
    %55 = math.exp %54 : vector<8x8x16xf32>
    %cst_23 = arith.constant dense<0.000000e+00> : vector<8x8xf32>
    %56 = vector.multi_reduction <add>, %55, %cst_23 [2] : vector<8x8x16xf32> to vector<8x8xf32>
    %57 = vector.shape_cast %56 : vector<8x8xf32> to vector<8x8x1xf32>
    %58 = vector.broadcast %57 : vector<8x8x1xf32> to vector<8x8x16xf32>
    %59 = arith.divf %55, %58 : vector<8x8x16xf32>
    "tpu.trace_start"() <{level = 10 : i32, message = "bqk,bkd->bqd"}> : () -> ()
    %cst_24 = arith.constant dense<0.000000e+00> : vector<8x8x8xf32>
    %60 = tpu.matmul %59, %47, %cst_24 {dimension_numbers = #tpu.dot_dimension_numbers<[2], [1], [1], [2], [0, 0, 0, 1, 1, 2], [0], [0]>} : vector<8x8x16xf32>, vector<8x16x8xf32>, vector<8x8x8xf32> -> vector<8x8x8xf32>
    "tpu.trace_stop"() : () -> ()
    %61 = vector.shape_cast %60 : vector<8x8x8xf32> to vector<2x4x8x8xf32>
    %62 = tpu.transpose %61, [2, 0, 1, 3] : vector<2x4x8x8xf32> -> vector<8x2x4x8xf32>
    %63 = vector.shape_cast %62 : vector<8x2x4x8xf32> to vector<16x32xf32>
    %cst_25 = arith.constant dense<0.000000e+00> : vector<16x32xf32>
    %64 = tpu.matmul %63, %7, %cst_25 {dimension_numbers = #tpu.dot_dimension_numbers<[1], [0], [0], [1], [0, 0, 1, 1], [], []>} : vector<16x32xf32>, vector<32x32xf32>, vector<16x32xf32> -> vector<16x32xf32>
    %65 = vector.shape_cast %16 : vector<32xf32> to vector<1x32xf32>
    %66 = vector.broadcast %65 : vector<1x32xf32> to vector<16x32xf32>
    %67 = arith.addf %64, %66 : vector<16x32xf32>
    %68 = arith.addf %21, %67 : vector<16x32xf32>
    %cst_26 = arith.constant dense<0.000000e+00> : vector<16xf32>
    %69 = vector.multi_reduction <add>, %68, %cst_26 [1] : vector<16x32xf32> to vector<16xf32>
    %70 = vector.shape_cast %69 : vector<16xf32> to vector<16x1xf32>
    %cst_27 = arith.constant 3.200000e+01 : f32
    %71 = vector.broadcast %cst_27 : f32 to vector<16x1xf32>
    %72 = arith.divf %70, %71 : vector<16x1xf32>
    %73 = vector.broadcast %72 : vector<16x1xf32> to vector<16x32xf32>
    %74 = arith.subf %68, %73 : vector<16x32xf32>
    %75 = arith.mulf %74, %74 : vector<16x32xf32>
    %cst_28 = arith.constant dense<0.000000e+00> : vector<16xf32>
    %76 = vector.multi_reduction <add>, %75, %cst_28 [1] : vector<16x32xf32> to vector<16xf32>
    %77 = vector.shape_cast %76 : vector<16xf32> to vector<16x1xf32>
    %cst_29 = arith.constant 3.200000e+01 : f32
    %78 = vector.broadcast %cst_29 : f32 to vector<16x1xf32>
    %79 = arith.divf %77, %78 : vector<16x1xf32>
    %cst_30 = arith.constant 9.99999974E-6 : f32
    %80 = vector.broadcast %cst_30 : f32 to vector<16x1xf32>
    %81 = arith.addf %79, %80 : vector<16x1xf32>
    %82 = math.rsqrt %81 : vector<16x1xf32>
    %83 = vector.broadcast %82 : vector<16x1xf32> to vector<16x32xf32>
    %84 = arith.mulf %74, %83 : vector<16x32xf32>
    %85 = vector.shape_cast %18 : vector<32xf32> to vector<1x32xf32>
    %86 = vector.broadcast %85 : vector<1x32xf32> to vector<16x32xf32>
    %87 = arith.mulf %84, %86 : vector<16x32xf32>
    %88 = vector.shape_cast %20 : vector<32xf32> to vector<1x32xf32>
    %89 = vector.broadcast %88 : vector<1x32xf32> to vector<16x32xf32>
    %90 = arith.addf %87, %89 : vector<16x32xf32>
    %c0_31 = arith.constant 0 : index
    %c0_32 = arith.constant 0 : index
    %91 = vector.load %arg7[%c0_31, %c0_32] : memref<16x32xf32, #tpu.memory_space<vmem>>, vector<16x32xf32>
    tpu.vector_store %arg7[%c0_31, %c0_32], %90 {strides = array<i32>} : memref<16x32xf32, #tpu.memory_space<vmem>>, vector<16x32xf32>,
    return
  }
  func.func @transform_0(%arg0: i32) -> (i32, i32) {
    %c0_i32 = arith.constant 0 : i32
    %c0_i32_0 = arith.constant 0 : i32
    return %arg0, %c0_i32 : i32, i32
  }
  func.func @transform_1(%arg0: i32) -> (i32, i32) {
    %c0_i32 = arith.constant 0 : i32
    %c0_i32_0 = arith.constant 0 : i32
    return %arg0, %c0_i32 : i32, i32
  }
  func.func @transform_2(%arg0: i32) -> (i32, i32) {
    %c0_i32 = arith.constant 0 : i32
    %c0_i32_0 = arith.constant 0 : i32
    %c0_i32_1 = arith.constant 0 : i32
    return %c0_i32, %c0_i32_0 : i32, i32
  }
  func.func @transform_3(%arg0: i32) -> (i32, i32) {
    %c0_i32 = arith.constant 0 : i32
    %c0_i32_0 = arith.constant 0 : i32
    %c0_i32_1 = arith.constant 0 : i32
    return %c0_i32, %c0_i32_0 : i32, i32
  }
  func.func @transform_4(%arg0: i32) -> (i32, i32, i32) {
    %c0_i32 = arith.constant 0 : i32
    %c0_i32_0 = arith.constant 0 : i32
    %c0_i32_1 = arith.constant 0 : i32
    %c0_i32_2 = arith.constant 0 : i32
    return %c0_i32, %c0_i32_0, %c0_i32_1 : i32, i32, i32
  }
  func.func @transform_5(%arg0: i32) -> (i32, i32) {
    %c0_i32 = arith.constant 0 : i32
    %c0_i32_0 = arith.constant 0 : i32
    %c0_i32_1 = arith.constant 0 : i32
    return %c0_i32, %c0_i32_0 : i32, i32
  }
  func.func @transform_6(%arg0: i32) -> (i32, i32) {
    %c0_i32 = arith.constant 0 : i32
    %c0_i32_0 = arith.constant 0 : i32
    return %arg0, %c0_i32 : i32, i32
  }
}

</mosaic_0001>

<bundles_post_ra>
// kernel: cross_attention_layer.1
= control target key start
LH: loop header
LB: loop body
LE: loop exit
PB: predicated region body
PF: predicated region fallthrough
CT: control target
= control target key end

     0   :  { %vm66_vm0 = vcmask 261120   ;;  %s4853_s0 = inlined_call_operand.vmem [shape: f32[16,32], index: 0, kind: input, shape index: {}]   ;;  %s4854_s1 = inlined_call_operand.vmem [shape: f32[16,32], index: 1, kind: input, shape index: {}]   ;;  %s4855_s2 = inlined_call_operand.vmem [shape: f32[32,32], index: 2, kind: input, shape index: {}]   ;;  %s4856_s3 = inlined_call_operand.vmem [shape: f32[32,32], index: 3, kind: input, shape index: {}]   ;;  %s4857_s4 = inlined_call_operand.vmem [shape: f32[4,32,32], index: 4, kind: input, shape index: {}]   ;;  %s4858_s5 = inlined_call_operand.vmem [shape: f32[6,32], index: 5, kind: input, shape index: {}]   ;;  %s4859_s6 = inlined_call_operand.hbm [shape: f32[16,32], index: 6, kind: output, shape index: {}]  }
   0x1   :  { %v3574_v0 = vld [vmem:[%s4857_s4 + $0x38] sm:$0xff]  ;;  %v3573_v1 = vld [vmem:[%s4857_s4 + $0x30] sm:$0xff]  ;;  %v3572_v2 = vld [vmem:[%s4857_s4 + $0x28] sm:$0xff] }
   0x2   :  { %3734 = vmatprep.subr.mxu1 %v3574_v0  ;;  %v50_v3 = vld [vmem:[%s4855_s2] sm:$0xff]  ;;  %v4023_v6 = vld [vmem:[%s4855_s2 + $0x8] sm:$0xff]  ;;  %v27_v8 = vld [vmem:[%s4857_s4 + $0x18] sm:$0xff] }
   0x3   :  { %v54_v4 = vld [vmem:[%s4856_s3] sm:$0xff]  ;;  %3735 = vmatpush3.msra.mxu1 %v3574_v0  ;;  %v55_v7 = vld [vmem:[%s4856_s3 + $0x8] sm:$0xff]  ;;  %3723 = vmatprep.subr.mxu0 %v27_v8  ;;  %v26_v10 = vld [vmem:[%s4857_s4 + $0x10] sm:$0xff] }
   0x4   :  { %v58_v5 = vadd.f32 %v54_v4, %v50_v3  ;;  %3736 = vmatprep.subr.mxu1 %v3573_v1  ;;  %v3571_v9 = vld [vmem:[%s4857_s4 + $0x20] sm:$0xff]  ;;  %v25_v11 = vld [vmem:[%s4857_s4 + $0x8] sm:$0xff]  ;;  %v59_v15 = vadd.f32 %v55_v7, %v4023_v6  ;;  %3724 = vmatpush3.msra.mxu0 %v27_v8  ;;  %v4057_v17 = vld [vmem:[%s4855_s2 + $0x10] sm:$0xff] }
   0x5   :  { %3737 = vmatpush3.msra.mxu1 %v3573_v1  ;;  %v44_v12 = vld [vmem:[%s4853_s0] sm:$0xff]  ;;  %v45_v14 = vld [vmem:[%s4853_s0 + $0x8] sm:$0xff]  ;;  %v56_v18 = vld [vmem:[%s4856_s3 + $0x10] sm:$0xff]  ;;  %3725 = vmatprep.subr.mxu0 %v26_v10 }
   0x6   :  { %3742 = vmatprep.mubr.msk.f32.mxu1 %vm66_vm0, %v58_v5  ;;  %v46_v13 = vld [vmem:[%s4854_s1] sm:$0xff]  ;;  %3738 = vmatprep.subr.mxu1 %v3572_v2  ;;  %v47_v16 = vld [vmem:[%s4854_s1 + $0x8] sm:$0xff]  ;;  %v4065_v20 = vld [vmem:[%s4855_s2 + $0x18] sm:$0xff]  ;;  %v60_v23 = vadd.f32 %v56_v18, %v4057_v17 }
   0x7   :  { %3739 = vmatpush3.msra.mxu1 %v3572_v2  ;;  %v48_v19 = vadd.f32 %v46_v13, %v44_v12  ;;  %v57_v21 = vld [vmem:[%s4856_s3 + $0x18] sm:$0xff]  ;;  %3726 = vmatpush3.msra.mxu0 %v26_v10  ;;  %v24_v22 = vld [vmem:[%s4857_s4] sm:$0xff] }
   0x8   :  { %3740 = vmatprep.subr.mxu1 %v3571_v9 }
   0x9   :  { %11 = vsyncpa [#allocation3], 0  ;;  %3741 = vmatpush3.msra.mxu1 %v3571_v9  ;;  %3727 = vmatprep.subr.mxu0 %v25_v11  ;;  %v49_v24 = vadd.f32 %v47_v16, %v45_v14  ;;  %v61_v25 = vadd.f32 %v57_v21, %v4065_v20  ;;  %v62_v26 = vlaneseq  ;;  %v4087_v29 = vld [vmem:[%s4858_s5] sm:$0x3f]  ;;  %s3958_s12 = smov 120   ;;  %s3959_s13 = smov 112  }
   0xa   :  { %3743 = vmatmul.mubr.msk.f32.vlgmr.msra.gmra.mxu1 %vm66_vm0, %v59_v15  ;;  %3728 = vmatpush3.msra.mxu0 %v25_v11  ;;  %s3960_s14 = smov 104   ;;  %v3578_v45 = vld [vmem:[%s4857_s4 + $0x58] sm:$0xff]  ;;  %v3577_v46 = vld [vmem:[%s4857_s4 + $0x50] sm:$0xff]  ;;  %v3576_v47 = vld [vmem:[%s4857_s4 + $0x48] sm:$0xff]  ;;  %v3961_v49 = vmov 0.0   ;;  %vm3962_vm1 = vmmov 0  }
   0xb   :  { %3729 = vmatprep.subr.mxu0 %v24_v22  ;;  %3731 = vmatprep.mubr.msk.f32.mxu0 %vm66_vm0, %v48_v19  ;;  %v4081_v27 = vshrl.u32 %v62_v26, 7  ;;  %v3575_v48 = vld [vmem:[%s4857_s4 + $0x40] sm:$0xff]  ;;  %v3963_v51 = vmov 1983009808   ;;  %v3964_v56 = vmov 1934713408  }
   0xc   :  { %3730 = vmatpush3.msra.mxu0 %v24_v22  ;;  %3745 = vmatprep.mubr.msk.f32.mxu1 %vm66_vm0, %v60_v23  ;;  %v373_v52 = vunpack.c.l.s4 %v3963_v51  ;;  %v405_v57 = vunpack.c.l.s4 %v3964_v56  ;;  %vm1810_vm2 = vcmask 64512   ;;  %vm2451_vm3 = vcmask 130048   ;;  %s3965_s7 = smov 8   ;;  %s3966_s8 = smov 24  }
   0xd   :  { %3732 = vmatmul.mubr.msk.f32.vlgmr.msra.gmra.mxu0 %vm66_vm0, %v49_v24  ;;  %v150_v28 = vsub.s32 1, %v4081_v27  ;;  %v64_v35 = vsub.s32 0, %v4081_v27  ;;  %3748 = vmatprep.subr.mxu0 %v3578_v45  ;;  %s3967_s9 = smov 16   ;;  %vm3424_vm4 = vcmask 195584  }
   0xe   :  { %3746 = vmatmul.mubr.msk.f32.gmra.mxu1 %vm66_vm0, %v61_v25  ;;  %3756 = vmatprep.mubr.msk.f32.mxu0 %vm66_vm0, %v50_v3  ;;  %v374_v55 = vunpack.c.0.s8 %v373_v52  ;;  %v406_v63 = vunpack.c.0.s8 %v405_v57 }
   0xf   :  { %v151_v30 = vrot.slane %v4087_v29, %v150_v28  ;;  %v65_v36 = vrot.slane %v4087_v29, %v64_v35  ;;  %3749 = vmatpush3.msra.mxu0 %v3578_v45  ;;  %3762 = vmatprep.subr.mxu1 %v3961_v49 }
  0x10   :  { %3750 = vmatprep.subr.mxu0 %v3577_v46  ;;  %3766 = vmatprep.mubr.msk.f32.mxu1 %vm3962_vm1, %v3961_v49  ;;  %v4165_v62 = vsub.s32 %v374_v55, %v4081_v27  ;;  %v4182_v15 = vsub.s32 %v406_v63, %v4081_v27 }
  0x11   :  { %3751 = vmatpush3.msra.mxu0 %v3577_v46 }
  0x12   :  { %3752 = vmatprep.subr.mxu0 %v3576_v47 }
  0x13   :  { %3753 = vmatpush3.msra.mxu0 %v3576_v47 }
  0x14   :  { %3754 = vmatprep.subr.mxu0 %v3575_v48 }
  0x15   :  { %3755 = vmatpush3.msra.mxu0 %v3575_v48 }
  0x16   :  { %3769 = vmatprep.subr.mxu0 %v3961_v49  ;;  %3757 = vmatmul.mubr.msk.f32.vlgmr.msra.gmra.mxu0 %vm66_vm0, %v4023_v6 }
  0x17   :  { %3759 = vmatprep.mubr.msk.f32.mxu0 %vm66_vm0, %v4057_v17 }
  0x1a   :  { %3760 = vmatmul.mubr.msk.f32.gmra.mxu0 %vm66_vm0, %v4065_v20 }
  0x1b   :  { %3773 = vmatprep.mubr.msk.f32.mxu0 %vm3962_vm1, %v3961_v49 }
  0xca   :  { %v3744_v31 = vpop.f32.mrf.mxu1 }
  0xcb   :  { %v4090_v32 = vadd.f32 %v3744_v31, %v151_v30 }
  0xcc   :  { %v230_v33 = vpop.f32.mrf.mxu1 }
  0xcd   :  { %v4092_v34 = vadd.f32 %v230_v33, %v151_v30  ;;  %648 = vrot.lane.b32.xlu1 %v4090_v32, %s3958_s12  ;;  %v3733_v37 = vpop.f32.mrf.mxu0 }
  0xce   :  { %v4104_v38 = vadd.f32 %v3733_v37, %v65_v36  ;;  %v3747_v40 = vpop.f32.mrf.mxu1 }
  0xcf   :  { %646 = vrot.lane.b32.xlu0 %v4092_v34, %s3958_s12  ;;  %v139_v39 = vpop.f32.mrf.mxu0  ;;  %v4114_v42 = vadd.f32 %v3747_v40, %v151_v30 }
  0xd0   :  { %v4110_v41 = vadd.f32 %v139_v39, %v65_v36  ;;  %v240_v43 = vpop.f32.mrf.mxu1 }
  0xd1   :  { %660 = vrot.lane.b32.xlu1 %v4090_v32, %s3959_s13  ;;  %v4122_v44 = vadd.f32 %v240_v43, %v151_v30 }
  0xd3   :  { %658 = vrot.lane.b32.xlu0 %v4092_v34, %s3959_s13 }
  0xd5   :  { %672 = vrot.lane.b32.xlu1 %v4090_v32, %s3960_s14 }
  0xd7   :  { %670 = vrot.lane.b32.xlu0 %v4092_v34, %s3960_s14 }
  0xd9   :  { %354 = vrot.lane.b32.xlu1 %v4104_v38, %s3958_s12 }
  0xdb   :  { %352 = vrot.lane.b32.xlu0 %v4110_v41, %s3958_s12 }
  0xdd   :  { %664 = vrot.lane.b32.xlu1 %v4114_v42, %s3959_s13 }
  0xdf   :  { %652 = vrot.lane.b32.xlu0 %v4114_v42, %s3958_s12 }
  0xe1   :  { %676 = vrot.lane.b32.xlu1 %v4114_v42, %s3960_s14 }
  0xe3   :  { %650 = vrot.lane.b32.xlu0 %v4122_v44, %s3958_s12 }
  0xe5   :  { %662 = vrot.lane.b32.xlu1 %v4122_v44, %s3959_s13 }
  0xe7   :  { %674 = vrot.lane.b32.xlu0 %v4122_v44, %s3960_s14 }
  0xe9   :  { %360 = vrot.lane.b32.xlu1 %v4104_v38, %s3959_s13 }
  0xeb   :  { %358 = vrot.lane.b32.xlu0 %v4110_v41, %s3959_s13 }
  0xed   :  { %366 = vrot.lane.b32.xlu1 %v4104_v38, %s3960_s14 }
  0xef   :  { %364 = vrot.lane.b32.xlu0 %v4110_v41, %s3960_s14 }
 0x13f   :  { %v649_v50 = vpop.permute.xlu1 %648 }
 0x141   :  { %v647_v53 = vpop.permute.xlu0 %646 }
 0x143   :  { %v661_v54 = vpop.permute.xlu1 %660 }
 0x144   :  { %v750_v0 = vcombine.low %v4090_v32, %v661_v54  ;;  %v751_v1 = vcombine.high %v4090_v32, %v661_v54 }
 0x145   :  { %v659_v58 = vpop.permute.xlu0 %658 }
 0x146   :  { %v682_v3 = vcombine.low %v4092_v34, %v659_v58  ;;  %v683_v4 = vcombine.high %v4092_v34, %v659_v58  ;;  %v758_v10 = vrot.slane %v750_v0, %v4165_v62  ;;  %v765_v11 = vrot.slane %v751_v1, %v4165_v62 }
 0x147   :  { %v673_v59 = vpop.permute.xlu1 %672 }
 0x148   :  { %v766_v60 = vcombine.low %v649_v50, %v673_v59  ;;  %v767_v61 = vcombine.high %v649_v50, %v673_v59  ;;  %v690_v16 = vrot.slane %v682_v3, %v4165_v62  ;;  %v697_v17 = vrot.slane %v683_v4, %v4165_v62 }
 0x149   :  { %v671_v2 = vpop.permute.xlu0 %670 }
 0x14a   :  { %v698_v5 = vcombine.low %v647_v53, %v671_v2  ;;  %v699_v6 = vcombine.high %v647_v53, %v671_v2  ;;  %v774_v7 = vrot.slane %v766_v60, %v4165_v62  ;;  %v781_v8 = vrot.slane %v767_v61, %v4165_v62 }
 0x14b   :  { %v4173_v9 = vpop.permute.xlu1 %354 }
 0x14c   :  { %v706_v12 = vrot.slane %v698_v5, %v4165_v62  ;;  %v713_v13 = vrot.slane %v699_v6, %v4165_v62  ;;  %v782_v18 = vcombine.low %v758_v10, %v774_v7  ;;  %v783_v19 = vcombine.high %v758_v10, %v774_v7 }
 0x14d   :  { %v4179_v14 = vpop.permute.xlu0 %352  ;;  %v798_v20 = vcombine.low %v765_v11, %v781_v8  ;;  %v799_v21 = vcombine.high %v765_v11, %v781_v8 }
 0x14e   :  { %v714_v23 = vcombine.low %v690_v16, %v706_v12  ;;  %v715_v24 = vcombine.high %v690_v16, %v706_v12  ;;  %v730_v25 = vcombine.low %v697_v17, %v713_v13  ;;  %v731_v26 = vcombine.high %v697_v17, %v713_v13 }
 0x14f   :  { %v665_v22 = vpop.permute.xlu1 %664  ;;  %v4187_v30 = vrot.slane %v782_v18, %v4182_v15  ;;  %v4190_v31 = vrot.slane %v783_v19, %v4182_v15  ;;  %v4193_v32 = vrot.slane %v798_v20, %v4182_v15  ;;  %v4196_v33 = vrot.slane %v799_v21, %v4182_v15 }
 0x150   :  { %v4199_v35 = vrot.slane %v714_v23, %v4182_v15  ;;  %v4202_v36 = vrot.slane %v715_v24, %v4182_v15  ;;  %v4205_v37 = vrot.slane %v730_v25, %v4182_v15  ;;  %v4208_v39 = vrot.slane %v731_v26, %v4182_v15 }
 0x151   :  { %v653_v28 = vpop.permute.xlu0 %652  ;;  %v886_v43 = vcombine.low %v4114_v42, %v665_v22  ;;  %v887_v45 = vcombine.high %v4114_v42, %v665_v22  ;;  %v970_v48 = vcombine.low %v4187_v30, %v4193_v32  ;;  %v978_v50 = vcombine.low %v4190_v31, %v4196_v33 }
 0x152   :  { %v954_v42 = vcombine.low %v4199_v35, %v4205_v37  ;;  %v962_v56 = vcombine.low %v4202_v36, %v4208_v39 }
 0x153   :  { %v677_v34 = vpop.permute.xlu1 %676  ;;  %v894_v52 = vrot.slane %v886_v43, %v4165_v62  ;;  %v901_v53 = vrot.slane %v887_v45, %v4165_v62  ;;  %v4227_v1 = vrot.slane %v970_v48, %v4165_v62  ;;  %v4230_v2 = vrot.slane %v978_v50, %v4165_v62 }
 0x154   :  { %v902_v46 = vcombine.low %v653_v28, %v677_v34  ;;  %v903_v47 = vcombine.high %v653_v28, %v677_v34  ;;  %v4249_v16 = vrot.slane %v954_v42, %v4165_v62  ;;  %v4252_v17 = vrot.slane %v962_v56, %v4165_v62 }
 0x155   :  { %v651_v40 = vpop.permute.xlu0 %650  ;;  %v1002_v45 = vcombine.low %v4227_v1, %v4230_v2 }
 0x156   :  { %v910_v54 = vrot.slane %v902_v46, %v4165_v62  ;;  %v917_v55 = vrot.slane %v903_v47, %v4165_v62  ;;  %v986_v46 = vcombine.low %v4249_v16, %v4252_v17 }
 0x157   :  { %v663_v51 = vpop.permute.xlu1 %662 }
 0x158   :  { %v818_v57 = vcombine.low %v4122_v44, %v663_v51  ;;  %v819_v58 = vcombine.high %v4122_v44, %v663_v51  ;;  %v918_v60 = vcombine.low %v894_v52, %v910_v54  ;;  %v919_v61 = vcombine.high %v894_v52, %v910_v54 }
 0x159   :  { %v675_v59 = vpop.permute.xlu0 %674  ;;  %v934_v63 = vcombine.low %v901_v53, %v917_v55  ;;  %v935_v0 = vcombine.high %v901_v53, %v917_v55 }
 0x15a   :  { %v834_v3 = vcombine.low %v651_v40, %v675_v59  ;;  %v835_v4 = vcombine.high %v651_v40, %v675_v59  ;;  %v4233_v5 = vrot.slane %v918_v60, %v4182_v15  ;;  %v4236_v6 = vrot.slane %v919_v61, %v4182_v15 }
 0x15b   :  { %v4239_v44 = vrot.slane %v934_v63, %v4182_v15  ;;  %v4242_v7 = vrot.slane %v935_v0, %v4182_v15  ;;  %v826_v8 = vrot.slane %v818_v57, %v4165_v62  ;;  %v833_v10 = vrot.slane %v819_v58, %v4165_v62  ;;  %v361_v13 = vpop.permute.xlu1 %360 }
 0x15c   :  { %v842_v11 = vrot.slane %v834_v3, %v4165_v62  ;;  %v849_v12 = vrot.slane %v835_v4, %v4165_v62  ;;  %v438_v50 = vcombine.low %v4104_v38, %v361_v13  ;;  %v439_v51 = vcombine.high %v4104_v38, %v361_v13 }
 0x15d   :  { %v1038_v18 = vcombine.low %v4233_v5, %v4239_v44  ;;  %v1046_v19 = vcombine.low %v4236_v6, %v4242_v7  ;;  %v359_v24 = vpop.permute.xlu0 %358  ;;  %v994_v38 = vrot.slane %v986_v46, %v4182_v15  ;;  %v1010_v0 = vrot.slane %v1002_v45, %v4182_v15 }
 0x15e   :  { %v850_v20 = vcombine.low %v826_v8, %v842_v11  ;;  %v851_v21 = vcombine.high %v826_v8, %v842_v11  ;;  %v866_v22 = vcombine.low %v833_v10, %v849_v12  ;;  %v867_v23 = vcombine.high %v833_v10, %v849_v12 }
 0x15f   :  { %v4259_v25 = vrot.slane %v1038_v18, %v4165_v62  ;;  %v4262_v26 = vrot.slane %v1046_v19, %v4165_v62  ;;  %v367_v52 = vpop.permute.xlu1 %366  ;;  %v370_v42 = vcombine.low %v4110_v41, %v359_v24  ;;  %v371_v56 = vcombine.high %v4110_v41, %v359_v24 }
 0x160   :  { %v4265_v28 = vrot.slane %v850_v20, %v4182_v15  ;;  %v4268_v34 = vrot.slane %v851_v21, %v4182_v15  ;;  %v4271_v40 = vrot.slane %v866_v22, %v4182_v15  ;;  %v4274_v43 = vrot.slane %v867_v23, %v4182_v15 }
 0x161   :  { %v1070_v53 = vcombine.low %v4259_v25, %v4262_v26  ;;  %v365_v57 = vpop.permute.xlu0 %364  ;;  %v454_v58 = vcombine.low %v4173_v9, %v367_v52  ;;  %v455_v59 = vcombine.high %v4173_v9, %v367_v52  ;;  %v446_v61 = vrot.slane %v438_v50, %v4165_v62 }
 0x162   :  { %v1022_v47 = vcombine.low %v4265_v28, %v4271_v40  ;;  %v1030_v48 = vcombine.low %v4268_v34, %v4274_v43  ;;  %v453_v63 = vrot.slane %v439_v51, %v4165_v62  ;;  %v386_v4 = vcombine.low %v4179_v14, %v365_v57 }
 0x163   :  { %v462_v3 = vrot.slane %v454_v58, %v4165_v62  ;;  %v469_v41 = vrot.slane %v455_v59, %v4165_v62  ;;  %v387_v9 = vcombine.high %v4179_v14, %v365_v57  ;;  %v378_v8 = vrot.slane %v370_v42, %v4165_v62 }
 0x164   :  { %v4289_v54 = vrot.slane %v1022_v47, %v4165_v62  ;;  %v4292_v55 = vrot.slane %v1030_v48, %v4165_v62  ;;  %v385_v10 = vrot.slane %v371_v56, %v4165_v62  ;;  %v1078_v12 = vrot.slane %v1070_v53, %v4182_v15 }
 0x165   :  { %v470_v13 = vcombine.low %v446_v61, %v462_v3  ;;  %v471_v18 = vcombine.high %v446_v61, %v462_v3  ;;  %v486_v19 = vcombine.low %v453_v63, %v469_v41  ;;  %v487_v20 = vcombine.high %v453_v63, %v469_v41 }
 0x166   :  { %v1054_v60 = vcombine.low %v4289_v54, %v4292_v55  ;;  %v394_v21 = vrot.slane %v386_v4, %v4165_v62  ;;  %v401_v22 = vrot.slane %v387_v9, %v4165_v62  ;;  %v1018_v56 = vcombine.low %v994_v38, %v1010_v0 }
 0x167   :  { %v4315_v14 = vrot.slane %v470_v13, %v4182_v15  ;;  %v4318_v45 = vrot.slane %v471_v18, %v4182_v15  ;;  %v4321_v46 = vrot.slane %v486_v19, %v4182_v15  ;;  %v4324_v47 = vrot.slane %v487_v20, %v4182_v15 }
 0x168   :  { %v1062_v11 = vrot.slane %v1054_v60, %v4182_v15  ;;  %v402_v48 = vcombine.low %v378_v8, %v394_v21  ;;  %v403_v50 = vcombine.high %v378_v8, %v394_v21  ;;  %v418_v51 = vcombine.low %v385_v10, %v401_v22 }
 0x169   :  { %v419_v52 = vcombine.high %v385_v10, %v401_v22  ;;  %v522_v53 = vcombine.low %v4315_v14, %v4321_v46  ;;  %v530_v42 = vcombine.low %v4318_v45, %v4324_v47  ;;  %v1019_v3 = vcombine.high %v994_v38, %v1010_v0 }
 0x16a   :  { %v1086_v23 = vcombine.low %v1062_v11, %v1078_v12  ;;  %v1087_v24 = vcombine.high %v1062_v11, %v1078_v12  ;;  %v4333_v57 = vrot.slane %v402_v48, %v4182_v15  ;;  %v4336_v58 = vrot.slane %v403_v50, %v4182_v15 }
 0x16b   :  { %v426_v59 = vrot.slane %v418_v51, %v4182_v15  ;;  %v433_v60 = vrot.slane %v419_v52, %v4182_v15  ;;  %v4342_v61 = vrot.slane %v522_v53, %v4165_v62  ;;  %v4345_v63 = vrot.slane %v530_v42, %v4165_v62 }
 0x16c   :  { %3763 = vmatpush3.xpose.msk.msra.mxu1 %vm1810_vm2, %v1086_v23  ;;  %3770 = vmatpush3.xpose.msk.msra.mxu0 %vm1810_vm2, %v1087_v24  ;;  %v3599_v41 = vcombine.high %v4187_v30, %v4193_v32  ;;  %v3600_v4 = vcombine.high %v4190_v31, %v4196_v33  ;;  %v3597_v10 = vcombine.high %v4199_v35, %v4205_v37 }
 0x16d   :  { %3764 = vmatprep.subr.mxu1 %v3961_v49  ;;  %3771 = vmatprep.subr.mxu0 %v3961_v49  ;;  %v506_v9 = vcombine.low %v4333_v57, %v426_v59  ;;  %v514_v8 = vcombine.low %v4336_v58, %v433_v60  ;;  %v1055_v11 = vcombine.high %v4289_v54, %v4292_v55 }
 0x16e   :  { %v3601_v38 = vcombine.high %v4265_v28, %v4271_v40  ;;  %v3602_v30 = vcombine.high %v4268_v34, %v4274_v43  ;;  %v3598_v31 = vcombine.high %v4202_v36, %v4208_v39  ;;  %v554_v32 = vcombine.low %v4342_v61, %v4345_v63 }
 0x16f   :  { %v513_v33 = vrot.slane %v506_v9, %v4165_v62  ;;  %v521_v35 = vrot.slane %v514_v8, %v4165_v62  ;;  %v1071_v37 = vcombine.high %v4259_v25, %v4262_v26  ;;  %v3603_v28 = vcombine.high %v4233_v5, %v4239_v44 }
 0x170   :  { %3765 = vmatpush3.xpose.msk.msra.mxu1 %vm1810_vm2, %v1018_v56  ;;  %3772 = vmatpush3.xpose.msk.msra.mxu0 %vm1810_vm2, %v1019_v3  ;;  %v3604_v34 = vcombine.high %v4236_v6, %v4242_v7  ;;  %v1003_v36 = vcombine.high %v4227_v1, %v4230_v2  ;;  %v4381_v39 = vrot.slane %v3599_v41, %v4165_v62 }
 0x171   :  { %3776 = vmatprep.subr.mxu1 %v3961_v49  ;;  %3783 = vmatprep.subr.mxu0 %v3961_v49  ;;  %v4384_v40 = vrot.slane %v3600_v4, %v4165_v62  ;;  %v538_v43 = vcombine.low %v513_v33, %v521_v35  ;;  %v987_v25 = vcombine.high %v4249_v16, %v4252_v17 }
 0x172   :  { %v4389_v5 = vrot.slane %v3601_v38, %v4165_v62  ;;  %v4392_v6 = vrot.slane %v3602_v30, %v4165_v62  ;;  %v1069_v44 = vrot.slane %v1055_v11, %v4182_v15  ;;  %v4396_v1 = vrot.slane %v3597_v10, %v4165_v62 }
 0x173   :  { %v4399_v2 = vrot.slane %v3598_v31, %v4165_v62  ;;  %v562_v7 = vrot.slane %v554_v32, %v4182_v15  ;;  %v546_v26 = vrot.slane %v538_v43, %v4182_v15  ;;  %v4404_v16 = vrot.slane %v3603_v28, %v4165_v62 }
 0x174   :  { %v4407_v17 = vrot.slane %v3604_v34, %v4165_v62  ;;  %v3593_v54 = vcombine.high %v4333_v57, %v426_v59  ;;  %v1085_v55 = vrot.slane %v1071_v37, %v4182_v15  ;;  %v539_v0 = vcombine.high %v513_v33, %v521_v35 }
 0x175   :  { %v3594_v12 = vcombine.high %v4336_v58, %v433_v60  ;;  %v570_v13 = vcombine.low %v546_v26, %v562_v7  ;;  %v571_v18 = vcombine.high %v546_v26, %v562_v7  ;;  %v1190_v19 = vcombine.low %v4389_v5, %v4392_v6 }
 0x176   :  { %v1088_v20 = vcombine.low %v1069_v44, %v1085_v55  ;;  %v1089_v21 = vcombine.high %v1069_v44, %v1085_v55  ;;  %v1001_v22 = vrot.slane %v987_v25, %v4182_v15  ;;  %v555_v23 = vcombine.high %v4342_v61, %v4345_v63 }
 0x177   :  { %v3595_v24 = vcombine.high %v4315_v14, %v4321_v46  ;;  %v3596_v48 = vcombine.high %v4318_v45, %v4324_v47  ;;  %3767 = vmatmul.mubr.msk.f32.vlgmr.msra.gmra.mxu1 %vm1810_vm2, %v570_v13  ;;  %3774 = vmatmul.mubr.msk.f32.vlgmr.msra.gmra.mxu0 %vm1810_vm2, %v571_v18  ;;  %v1122_v50 = vcombine.low %v4396_v1, %v4399_v2 }
 0x178   :  { %v1206_v51 = vcombine.low %v4404_v16, %v4407_v17  ;;  %3777 = vmatpush3.xpose.msk.msra.mxu1 %vm1810_vm2, %v1088_v20  ;;  %3784 = vmatpush3.xpose.msk.msra.mxu0 %vm1810_vm2, %v1089_v21  ;;  %v1017_v52 = vrot.slane %v1003_v36, %v4182_v15  ;;  %v4431_v14 = vrot.slane %v3593_v54, %v4165_v62  ;;  %v3758_v54 = vpop.f32.mrf.mxu0 }
 0x179   :  { %v4434_v45 = vrot.slane %v3594_v12, %v4165_v62  ;;  %3778 = vmatprep.subr.mxu1 %v3961_v49  ;;  %3785 = vmatprep.subr.mxu0 %v3961_v49  ;;  %v553_v46 = vrot.slane %v539_v0, %v4182_v15  ;;  %v1198_v42 = vrot.slane %v1190_v19, %v4182_v15 }
 0x17a   :  { %v1020_v47 = vcombine.low %v1001_v22, %v1017_v52  ;;  %v1021_v53 = vcombine.high %v1001_v22, %v1017_v52  ;;  %3780 = vmatprep.mubr.msk.f32.mxu1 %vm3962_vm1, %v3961_v49  ;;  %3787 = vmatprep.mubr.msk.f32.mxu0 %vm3962_vm1, %v3961_v49  ;;  %v597_v56 = vrot.slane %v3595_v24, %v4165_v62  ;;  %v331_v55 = vpop.f32.mrf.mxu0 }
 0x17b   :  { %v605_v57 = vrot.slane %v3596_v48, %v4165_v62  ;;  %v569_v58 = vrot.slane %v555_v23, %v4182_v15  ;;  %v1138_v59 = vcombine.low %v4381_v39, %v4384_v40  ;;  %v1214_v60 = vrot.slane %v1206_v51, %v4182_v15 }
 0x17c   :  { %3779 = vmatpush3.xpose.msk.msra.mxu1 %vm1810_vm2, %v1020_v47  ;;  %3786 = vmatpush3.xpose.msk.msra.mxu0 %vm1810_vm2, %v1021_v53  ;;  %v606_v61 = vcombine.low %v4431_v14, %v4434_v45  ;;  %v1191_v41 = vcombine.high %v4389_v5, %v4392_v6  ;;  %v1130_v8 = vrot.slane %v1122_v50, %v4182_v15  ;;  %v3761_v0 = vpop.f32.mrf.mxu0 }
 0x17d   :  { %v572_v63 = vcombine.low %v553_v46, %v569_v58  ;;  %v573_v3 = vcombine.high %v553_v46, %v569_v58  ;;  %3790 = vmatprep.subr.mxu1 %v3961_v49  ;;  %3797 = vmatprep.subr.mxu0 %v3961_v49  ;;  %v1222_v4 = vcombine.low %v1198_v42, %v1214_v60 }
 0x17e   :  { %v1223_v9 = vcombine.high %v1198_v42, %v1214_v60  ;;  %v622_v10 = vcombine.low %v597_v56, %v605_v57  ;;  %v1207_v11 = vcombine.high %v4404_v16, %v4407_v17  ;;  %v1146_v38 = vrot.slane %v1138_v59, %v4182_v15  ;;  %v341_v12 = vpop.f32.mrf.mxu0 }
 0x17f   :  { %3781 = vmatmul.mubr.msk.f32.vlgmr.msra.gmra.mxu1 %vm1810_vm2, %v572_v63  ;;  %3788 = vmatmul.mubr.msk.f32.vlgmr.msra.gmra.mxu0 %vm1810_vm2, %v573_v3  ;;  %v1123_v30 = vcombine.high %v4396_v1, %v4399_v2  ;;  %v614_v31 = vrot.slane %v606_v61, %v4182_v15  ;;  %v1205_v35 = vrot.slane %v1191_v41, %v4182_v15 }
 0x180   :  { %3791 = vmatpush3.xpose.msk.msra.mxu1 %vm1810_vm2, %v1222_v4  ;;  %3798 = vmatpush3.xpose.msk.msra.mxu0 %vm1810_vm2, %v1223_v9  ;;  %v1154_v32 = vcombine.low %v1130_v8, %v1146_v38  ;;  %v1155_v33 = vcombine.high %v1130_v8, %v1146_v38  ;;  %v630_v37 = vrot.slane %v622_v10, %v4182_v15  ;;  %v251_v38 = vsub.s32 2, %v4081_v27 }
 0x181   :  { %3792 = vmatprep.subr.mxu1 %v3961_v49  ;;  %3799 = vmatprep.subr.mxu0 %v3961_v49  ;;  %v1139_v28 = vcombine.high %v4381_v39, %v4384_v40  ;;  %v1221_v34 = vrot.slane %v1207_v11, %v4182_v15  ;;  %v607_v36 = vcombine.high %v4431_v14, %v4434_v45 }
 0x182   :  { %3794 = vmatprep.mubr.msk.f32.mxu1 %vm3962_vm1, %v3961_v49  ;;  %3801 = vmatprep.mubr.msk.f32.mxu0 %vm3962_vm1, %v3961_v49  ;;  %v638_v43 = vcombine.low %v614_v31, %v630_v37  ;;  %v639_v25 = vcombine.high %v614_v31, %v630_v37  ;;  %v1137_v44 = vrot.slane %v1123_v30, %v4182_v15 }
 0x183   :  { %v1224_v5 = vcombine.low %v1205_v35, %v1221_v34  ;;  %v1225_v6 = vcombine.high %v1205_v35, %v1221_v34  ;;  %v623_v39 = vcombine.high %v597_v56, %v605_v57  ;;  %v1153_v40 = vrot.slane %v1139_v28, %v4182_v15 }
 0x184   :  { %3793 = vmatpush3.xpose.msk.msra.mxu1 %vm1810_vm2, %v1154_v32  ;;  %3800 = vmatpush3.xpose.msk.msra.mxu0 %vm1810_vm2, %v1155_v33  ;;  %v621_v1 = vrot.slane %v607_v36, %v4182_v15  ;;  %v252_v30 = vrot.slane %v4087_v29, %v251_v38 }
 0x185   :  { %3804 = vmatprep.subr.mxu1 %v3961_v49  ;;  %3811 = vmatprep.subr.mxu0 %v3961_v49  ;;  %v1156_v2 = vcombine.low %v1137_v44, %v1153_v40  ;;  %v1157_v7 = vcombine.high %v1137_v44, %v1153_v40  ;;  %v637_v26 = vrot.slane %v623_v39, %v4182_v15 }
 0x186   :  { %v4523_v31 = vadd.f32 %v341_v12, %v252_v30  ;;  %v4527_v32 = vadd.f32 %v3761_v0, %v252_v30  ;;  %v4539_v29 = vadd.f32 %v331_v55, %v252_v30  ;;  %v4543_v33 = vadd.f32 %v3758_v54, %v252_v30 }
 0x187   :  { %3795 = vmatmul.mubr.msk.f32.vlgmr.msra.gmra.mxu1 %vm1810_vm2, %v638_v43  ;;  %3802 = vmatmul.mubr.msk.f32.vlgmr.msra.gmra.mxu0 %vm1810_vm2, %v639_v25  ;;  %v640_v16 = vcombine.low %v621_v1, %v637_v26  ;;  %v641_v17 = vcombine.high %v621_v1, %v637_v26 }
 0x188   :  { %3805 = vmatpush3.xpose.msk.msra.mxu1 %vm1810_vm2, %v1224_v5  ;;  %3812 = vmatpush3.xpose.msk.msra.mxu0 %vm1810_vm2, %v1225_v6 }
 0x189   :  { %3806 = vmatprep.subr.mxu1 %v3961_v49  ;;  %3813 = vmatprep.subr.mxu0 %v3961_v49 }
 0x18a   :  { %3808 = vmatprep.mubr.msk.f32.mxu1 %vm3962_vm1, %v3961_v49  ;;  %3815 = vmatprep.mubr.msk.f32.mxu0 %vm3962_vm1, %v3961_v49 }
 0x18c   :  { %3807 = vmatpush3.xpose.msk.msra.mxu1 %vm1810_vm2, %v1156_v2  ;;  %3814 = vmatpush3.xpose.msk.msra.mxu0 %vm1810_vm2, %v1157_v7 }
 0x18d   :  { %3818 = vmatprep.subr.mxu1 %v3961_v49  ;;  %3846 = vmatprep.subr.mxu0 %v3961_v49 }
 0x18f   :  { %3809 = vmatmul.mubr.msk.f32.vlgmr.msra.gmra.mxu1 %vm1810_vm2, %v640_v16  ;;  %3816 = vmatmul.mubr.msk.f32.vlgmr.msra.gmra.mxu0 %vm1810_vm2, %v641_v17 }
 0x190   :  { %3822 = vmatprep.mubr.msk.f32.mxu1 %vm3962_vm1, %v3961_v49  ;;  %3850 = vmatprep.mubr.msk.f32.mxu0 %vm3962_vm1, %v3961_v49 }
 0x237   :  { %v1886_v13 = vpop.f32.mrf.mxu1  ;;  %v1965_v18 = vpop.f32.mrf.mxu0 }
 0x238   :  { %v2443_v19 = vmul.f32 0.35355338, %v1886_v13  ;;  %v2444_v20 = vmul.f32 0.35355338, %v1965_v18 }
 0x239   :  { %v3768_v21 = vpop.f32.mrf.mxu1  ;;  %v3775_v22 = vpop.f32.mrf.mxu0 }
 0x23a   :  { %v2455_v23 = vsel %vm2451_vm3, %v2444_v20, -inf  ;;  %v2452_v24 = vsel %vm2451_vm3, %v2443_v19, -inf }
 0x23b   :  { %2456 = vmax.xlane.f32.xlu1 %v2455_v23  ;;  %2453 = vmax.xlane.f32.xlu0 %v2452_v24 }
 0x23f   :  { %v2044_v48 = vpop.f32.mrf.mxu1  ;;  %v2123_v50 = vpop.f32.mrf.mxu0 }
 0x240   :  { %v2445_v51 = vmul.f32 0.35355338, %v2044_v48  ;;  %v4512_v45 = vmul.f32 0.35355338, %v2123_v50 }
 0x241   :  { %v3782_v52 = vpop.f32.mrf.mxu1  ;;  %v3789_v14 = vpop.f32.mrf.mxu0 }
 0x242   :  { %v2458_v46 = vsel %vm2451_vm3, %v2445_v51, -inf  ;;  %v2461_v47 = vsel %vm2451_vm3, %v4512_v45, -inf }
 0x243   :  { %2459 = vmax.xlane.f32.xlu0 %v2458_v46 }
 0x247   :  { %v2281_v53 = vpop.f32.mrf.mxu0  ;;  %2462 = vmax.xlane.f32.xlu0 %v2461_v47  ;;  %v2202_v42 = vpop.f32.mrf.mxu1 }
 0x248   :  { %v2448_v56 = vmul.f32 0.35355338, %v2281_v53  ;;  %v2447_v57 = vmul.f32 0.35355338, %v2202_v42 }
 0x249   :  { %v3796_v58 = vpop.f32.mrf.mxu1  ;;  %v3803_v59 = vpop.f32.mrf.mxu0 }
 0x24a   :  { %v2467_v60 = vsel %vm2451_vm3, %v2448_v56, -inf  ;;  %v2464_v61 = vsel %vm2451_vm3, %v2447_v57, -inf }
 0x24b   :  { %2468 = vmax.xlane.f32.xlu0 %v2467_v60  ;;  %2465 = vmax.xlane.f32.xlu1 %v2464_v61 }
 0x24f   :  { %v2360_v63 = vpop.f32.mrf.mxu1  ;;  %v2439_v3 = vpop.f32.mrf.mxu0 }
 0x250   :  { %v2449_v41 = vmul.f32 0.35355338, %v2360_v63  ;;  %v2450_v4 = vmul.f32 0.35355338, %v2439_v3 }
 0x251   :  { %v3810_v9 = vpop.f32.mrf.mxu1  ;;  %v3817_v8 = vpop.f32.mrf.mxu0 }
 0x252   :  { %v2473_v10 = vsel %vm2451_vm3, %v2450_v4, -inf  ;;  %v2470_v11 = vsel %vm2451_vm3, %v2449_v41, -inf }
 0x253   :  { %2474 = vmax.xlane.f32.xlu0 %v2473_v10  ;;  %2471 = vmax.xlane.f32.xlu1 %v2470_v11 }
 0x264   :  { %1234 = vrot.lane.b32.xlu1 %v4523_v31, %s3958_s12 }
 0x268   :  { %1246 = vrot.lane.b32.xlu1 %v4523_v31, %s3959_s13 }
 0x269   :  { %1236 = vrot.lane.b32.xlu0 %v4527_v32, %s3958_s12 }
 0x26c   :  { %1248 = vrot.lane.b32.xlu1 %v4527_v32, %s3959_s13 }
 0x26d   :  { %1258 = vrot.lane.b32.xlu0 %v4523_v31, %s3960_s14 }
 0x270   :  { %1260 = vrot.lane.b32.xlu1 %v4527_v32, %s3960_s14 }
 0x274   :  { %1230 = vrot.lane.b32.xlu1 %v4539_v29, %s3958_s12 }
 0x278   :  { %1232 = vrot.lane.b32.xlu1 %v4543_v33, %s3958_s12 }
 0x27c   :  { %1242 = vrot.lane.b32.xlu1 %v4539_v29, %s3959_s13 }
 0x280   :  { %1244 = vrot.lane.b32.xlu1 %v4543_v33, %s3959_s13 }
 0x284   :  { %1254 = vrot.lane.b32.xlu1 %v4539_v29, %s3960_s14 }
 0x2c4   :  { %v2457_v35 = vpop.xlane.xlu1 %2456  ;;  %v2454_v37 = vpop.xlane.xlu0 %2453 }
 0x2c5   :  { %v2477_v28 = vsub.f32 %v2444_v20, %v2457_v35  ;;  %v2476_v34 = vsub.f32 %v2443_v19, %v2454_v37 }
 0x2c7   :  { %v2486_v36 = vmul.f32 1.442695, %v2477_v28  ;;  %v2484_v43 = vmul.f32 1.442695, %v2476_v34 }
 0x2c9   :  { %3897 = vpow2.f32 %v2486_v36 }
 0x2ca   :  { %3899 = vpow2.f32 %v2484_v43 }
 0x2cc   :  { %v2460_v25 = vpop.xlane.xlu0 %2459 }
 0x2cd   :  { %v2478_v5 = vsub.f32 %v2445_v51, %v2460_v25 }
 0x2cf   :  { %v2488_v6 = vmul.f32 1.442695, %v2478_v5 }
 0x2d0   :  { %v4553_v44 = vpop.xlane.xlu0 %2462 }
 0x2d1   :  { %3901 = vpow2.f32 %v2488_v6 }
 0x2d4   :  { %v2469_v39 = vpop.xlane.xlu0 %2468  ;;  %v2466_v40 = vpop.xlane.xlu1 %2465 }
 0x2d5   :  { %v2481_v1 = vsub.f32 %v2448_v56, %v2469_v39  ;;  %v2480_v2 = vsub.f32 %v2447_v57, %v2466_v40 }
 0x2d6   :  { %v4555_v7 = vpop.eup %3897 }
 0x2d7   :  { %v4557_v26 = vpop.eup %3899  ;;  %v2492_v16 = vmul.f32 1.442695, %v2480_v2  ;;  %v2503_v17 = vsel %vm2451_vm3, %v4555_v7, 0.0  ;;  %v2494_v54 = vmul.f32 1.442695, %v2481_v1 }
 0x2d8   :  { %2504 = vadd.xlane.f32.xlu0 %v2503_v17  ;;  %v2500_v55 = vsel %vm2451_vm3, %v4557_v26, 0.0 }
 0x2d9   :  { %2501 = vadd.xlane.f32.xlu1 %v2500_v55  ;;  %3903 = vpow2.f32 %v2492_v16 }
 0x2da   :  { %3905 = vpow2.f32 %v2494_v54 }
 0x2dc   :  { %v2475_v0 = vpop.xlane.xlu0 %2474  ;;  %v2472_v12 = vpop.xlane.xlu1 %2471 }
 0x2dd   :  { %v2483_v13 = vsub.f32 %v2450_v4, %v2475_v0  ;;  %v2482_v18 = vsub.f32 %v2449_v41, %v2472_v12 }
 0x2de   :  { %v4563_v19 = vpop.eup %3901 }
 0x2df   :  { %v2498_v20 = vmul.f32 1.442695, %v2483_v13  ;;  %v2496_v21 = vmul.f32 1.442695, %v2482_v18  ;;  %v2506_v22 = vsel %vm2451_vm3, %v4563_v19, 0.0 }
 0x2e0   :  { %2507 = vadd.xlane.f32.xlu0 %v2506_v22  ;;  %v1237_v23 = vpop.permute.xlu0 %1236  ;;  %v1235_v24 = vpop.permute.xlu1 %1234 }
 0x2e1   :  { %3907 = vpow2.f32 %v2496_v21 }
 0x2e2   :  { %3909 = vpow2.f32 %v2498_v20 }
 0x2e4   :  { %v1259_v48 = vpop.permute.xlu0 %1258  ;;  %v1247_v50 = vpop.permute.xlu1 %1246 }
 0x2e5   :  { %v1418_v51 = vcombine.low %v1235_v24, %v1259_v48  ;;  %v1419_v52 = vcombine.high %v1235_v24, %v1259_v48  ;;  %v1402_v14 = vcombine.low %v4523_v31, %v1247_v50  ;;  %v1403_v46 = vcombine.high %v4523_v31, %v1247_v50 }
 0x2e6   :  { %v4569_v47 = vpop.eup %3903  ;;  %v2479_v50 = vsub.f32 %v4512_v45, %v4553_v44 }
 0x2e7   :  { %v1426_v53 = vrot.slane %v1418_v51, %v4165_v62  ;;  %v1433_v42 = vrot.slane %v1419_v52, %v4165_v62  ;;  %v1410_v56 = vrot.slane %v1402_v14, %v4165_v62  ;;  %v1417_v57 = vrot.slane %v1403_v46, %v4165_v62  ;;  %v4577_v60 = vpop.eup %3905 }
 0x2e8   :  { %v2512_v58 = vsel %vm2451_vm3, %v4569_v47, 0.0  ;;  %v1249_v59 = vpop.permute.xlu1 %1248  ;;  %v2515_v30 = vsel %vm2451_vm3, %v4577_v60, 0.0 }
 0x2e9   :  { %v1434_v61 = vcombine.low %v1410_v56, %v1426_v53  ;;  %v1435_v63 = vcombine.high %v1410_v56, %v1426_v53  ;;  %v1450_v3 = vcombine.low %v1417_v57, %v1433_v42  ;;  %v1451_v41 = vcombine.high %v1417_v57, %v1433_v42  ;;  %2513 = vadd.xlane.f32.xlu0 %v2512_v58 }
 0x2ea   :  { %v1470_v4 = vcombine.low %v4527_v32, %v1249_v59  ;;  %1256 = vrot.lane.b32.xlu1 %v4543_v33, %s3960_s14  ;;  %v1471_v38 = vcombine.high %v4527_v32, %v1249_v59 }
 0x2eb   :  { %v1442_v9 = vrot.slane %v1434_v61, %v4182_v15  ;;  %v1449_v8 = vrot.slane %v1435_v63, %v4182_v15  ;;  %v1458_v10 = vrot.slane %v1450_v3, %v4182_v15  ;;  %v1465_v11 = vrot.slane %v1451_v41, %v4182_v15 }
 0x2ec   :  { %v1261_v31 = vpop.permute.xlu1 %1260  ;;  %v1478_v36 = vrot.slane %v1470_v4, %v4165_v62  ;;  %v1485_v2 = vrot.slane %v1471_v38, %v4165_v62  ;;  %v2490_v61 = vmul.f32 1.442695, %v2479_v50 }
 0x2ed   :  { %v1606_v35 = vcombine.low %v1442_v9, %v1458_v10  ;;  %v1614_v37 = vcombine.low %v1449_v8, %v1465_v11  ;;  %v3609_v28 = vcombine.high %v1442_v9, %v1458_v10  ;;  %v3610_v34 = vcombine.high %v1449_v8, %v1465_v11  ;;  %2516 = vadd.xlane.f32.xlu0 %v2515_v30 }
 0x2ee   :  { %v1486_v43 = vcombine.low %v1237_v23, %v1261_v31  ;;  %v1487_v25 = vcombine.high %v1237_v23, %v1261_v31  ;;  %v4590_v5 = vpop.eup %3907  ;;  %3911 = vpow2.f32 %v2490_v61 }
 0x2ef   :  { %v1613_v6 = vrot.slane %v1606_v35, %v4165_v62  ;;  %v1621_v39 = vrot.slane %v1614_v37, %v4165_v62  ;;  %v1749_v32 = vrot.slane %v3609_v28, %v4165_v62  ;;  %v1757_v40 = vrot.slane %v3610_v34, %v4165_v62  ;;  %v4596_v1 = vpop.eup %3909 }
 0x2f0   :  { %v1494_v16 = vrot.slane %v1486_v43, %v4165_v62  ;;  %v1501_v17 = vrot.slane %v1487_v25, %v4165_v62  ;;  %v2518_v54 = vsel %vm2451_vm3, %v4590_v5, 0.0  ;;  %v2521_v21 = vsel %vm2451_vm3, %v4596_v1, 0.0 }
 0x2f1   :  { %2519 = vadd.xlane.f32.xlu0 %v2518_v54  ;;  %v1639_v55 = vcombine.high %v1613_v6, %v1621_v39  ;;  %v1775_v0 = vcombine.high %v1749_v32, %v1757_v40  ;;  %v1638_v53 = vcombine.low %v1613_v6, %v1621_v39  ;;  %v1774_v42 = vcombine.low %v1749_v32, %v1757_v40  ;;  %v1231_v32 = vpop.permute.xlu1 %1230 }
 0x2f2   :  { %v1502_v12 = vcombine.low %v1478_v36, %v1494_v16  ;;  %v1503_v13 = vcombine.high %v1478_v36, %v1494_v16  ;;  %v1518_v18 = vcombine.low %v1485_v2, %v1501_v17  ;;  %v1519_v20 = vcombine.high %v1485_v2, %v1501_v17 }
 0x2f3   :  { %v4616_v44 = vrot.slane %v1638_v53, %v4182_v15  ;;  %v4619_v4 = vrot.slane %v1774_v42, %v4182_v15  ;;  %v4622_v9 = vrot.slane %v1639_v55, %v4182_v15  ;;  %v4637_v30 = vrot.slane %v1775_v0, %v4182_v15 }
 0x2f4   :  { %v1510_v22 = vrot.slane %v1502_v12, %v4182_v15  ;;  %v1517_v23 = vrot.slane %v1503_v13, %v4182_v15  ;;  %v1526_v24 = vrot.slane %v1518_v18, %v4182_v15  ;;  %v1533_v48 = vrot.slane %v1519_v20, %v4182_v15 }
 0x2f5   :  { %2522 = vadd.xlane.f32.xlu0 %v2521_v21  ;;  %v1233_v40 = vpop.permute.xlu1 %1232 }
 0x2f6   :  { %v1622_v51 = vcombine.low %v1510_v22, %v1526_v24  ;;  %v1630_v52 = vcombine.low %v1517_v23, %v1533_v48  ;;  %v3611_v14 = vcombine.high %v1510_v22, %v1526_v24  ;;  %v3612_v46 = vcombine.high %v1517_v23, %v1533_v48 }
 0x2f8   :  { %v1629_v56 = vrot.slane %v1622_v51, %v4165_v62  ;;  %v1637_v57 = vrot.slane %v1630_v52, %v4165_v62  ;;  %v1765_v58 = vrot.slane %v3611_v14, %v4165_v62  ;;  %v1773_v59 = vrot.slane %v3612_v46, %v4165_v62 }
 0x2f9   :  { %v1243_v2 = vpop.permute.xlu1 %1242 }
 0x2fa   :  { %v1654_v63 = vcombine.low %v1629_v56, %v1637_v57  ;;  %v1790_v3 = vcombine.low %v1765_v58, %v1773_v59  ;;  %v1655_v41 = vcombine.high %v1629_v56, %v1637_v57  ;;  %v1791_v45 = vcombine.high %v1765_v58, %v1773_v59 }
 0x2fb   :  { %v4657_v6 = vpop.eup %3911  ;;  %v1266_v0 = vcombine.low %v4539_v29, %v1243_v2  ;;  %v1267_v12 = vcombine.high %v4539_v29, %v1243_v2 }
 0x2fc   :  { %v4625_v8 = vrot.slane %v1654_v63, %v4182_v15  ;;  %v4628_v10 = vrot.slane %v1790_v3, %v4182_v15  ;;  %v4631_v11 = vrot.slane %v1655_v41, %v4182_v15  ;;  %v4634_v38 = vrot.slane %v1791_v45, %v4182_v15 }
 0x2fd   :  { %v2509_v39 = vsel %vm2451_vm3, %v4657_v6, 0.0  ;;  %v1245_v16 = vpop.permute.xlu1 %1244  ;;  %v1274_v20 = vrot.slane %v1266_v0, %v4165_v62  ;;  %v1281_v21 = vrot.slane %v1267_v12, %v4165_v62 }
 0x2fe   :  { %v1670_v31 = vcombine.low %v4616_v44, %v4625_v8  ;;  %v1806_v35 = vcombine.low %v4619_v4, %v4628_v10  ;;  %v1671_v37 = vcombine.high %v4616_v44, %v4625_v8  ;;  %v1672_v28 = vcombine.low %v4622_v9, %v4631_v11 }
 0x2ff   :  { %v1808_v34 = vcombine.low %v4637_v30, %v4634_v38  ;;  %v1673_v36 = vcombine.high %v4622_v9, %v4631_v11  ;;  %v1807_v43 = vcombine.high %v4619_v4, %v4628_v10  ;;  %v1809_v25 = vcombine.high %v4637_v30, %v4634_v38 }
 0x300   :  { %3819 = vmatpush3.msra.mxu1 %v1670_v31  ;;  %3847 = vmatpush3.msra.mxu0 %v1806_v35  ;;  %v1334_v46 = vcombine.low %v4543_v33, %v1245_v16  ;;  %v1335_v53 = vcombine.high %v4543_v33, %v1245_v16 }
 0x301   :  { %3820 = vmatprep.subr.mxu1 %v3961_v49  ;;  %3848 = vmatprep.subr.mxu0 %v3961_v49  ;;  %v1255_v17 = vpop.permute.xlu1 %1254 }
 0x302   :  { %v1282_v54 = vcombine.low %v1231_v32, %v1255_v17  ;;  %v1283_v55 = vcombine.high %v1231_v32, %v1255_v17  ;;  %v1342_v3 = vrot.slane %v1334_v46, %v4165_v62  ;;  %v1349_v41 = vrot.slane %v1335_v53, %v4165_v62 }
 0x304   :  { %v1290_v13 = vrot.slane %v1282_v54, %v4165_v62  ;;  %v1297_v18 = vrot.slane %v1283_v55, %v4165_v62 }
 0x306   :  { %v1298_v22 = vcombine.low %v1274_v20, %v1290_v13  ;;  %v1314_v23 = vcombine.low %v1281_v21, %v1297_v18  ;;  %v1299_v24 = vcombine.high %v1274_v20, %v1290_v13  ;;  %v1315_v48 = vcombine.high %v1281_v21, %v1297_v18 }
 0x308   :  { %v1306_v50 = vrot.slane %v1298_v22, %v4182_v15  ;;  %v1322_v51 = vrot.slane %v1314_v23, %v4182_v15  ;;  %v1313_v14 = vrot.slane %v1299_v24, %v4182_v15  ;;  %v1329_v29 = vrot.slane %v1315_v48, %v4182_v15 }
 0x30a   :  { %v1538_v42 = vcombine.low %v1306_v50, %v1322_v51  ;;  %v1546_v59 = vcombine.low %v1313_v14, %v1329_v29  ;;  %v3605_v61 = vcombine.high %v1306_v50, %v1322_v51  ;;  %v3606_v63 = vcombine.high %v1313_v14, %v1329_v29 }
 0x30c   :  { %v4680_v17 = vrot.slane %v3605_v61, %v4165_v62  ;;  %v4683_v54 = vrot.slane %v3606_v63, %v4165_v62 }
 0x30e   :  { %2510 = vadd.xlane.f32.xlu1 %v2509_v39  ;;  %v1545_v39 = vrot.slane %v1538_v42, %v4165_v62  ;;  %v1706_v48 = vcombine.low %v4680_v17, %v4683_v54  ;;  %v1707_v44 = vcombine.high %v4680_v17, %v4683_v54 }
 0x361   :  { %v2505_v45 = vpop.xlane.xlu0 %2504 }
 0x362   :  { %v2502_v52 = vpop.xlane.xlu1 %2501 }
 0x363   :  { %3913 = vrcp.f32 %v2502_v52 }
 0x364   :  { %3915 = vrcp.f32 %v2505_v45 }
 0x366   :  { %v1257_v56 = vpop.permute.xlu1 %1256 }
 0x367   :  { %v1350_v57 = vcombine.low %v1233_v40, %v1257_v56  ;;  %v1351_v58 = vcombine.high %v1233_v40, %v1257_v56  ;;  %v1553_v40 = vrot.slane %v1546_v59, %v4165_v62 }
 0x369   :  { %v1358_v31 = vrot.slane %v1350_v57, %v4165_v62  ;;  %v1365_v35 = vrot.slane %v1351_v58, %v4165_v62  ;;  %v2508_v18 = vpop.xlane.xlu0 %2507  ;;  %v1570_v24 = vcombine.low %v1545_v39, %v1553_v40  ;;  %v4698_v58 = vrot.slane %v1706_v48, %v4182_v15 }
 0x36a   :  { %3917 = vrcp.f32 %v2508_v18 }
 0x36b   :  { %v1366_v33 = vcombine.low %v1342_v3, %v1358_v31  ;;  %v1367_v32 = vcombine.high %v1342_v3, %v1358_v31  ;;  %v1382_v2 = vcombine.low %v1349_v41, %v1365_v35  ;;  %v1383_v16 = vcombine.high %v1349_v41, %v1365_v35 }
 0x36c   :  { %v1578_v56 = vrot.slane %v1570_v24, %v4182_v15  ;;  %v1571_v35 = vcombine.high %v1545_v39, %v1553_v40 }
 0x36d   :  { %v1374_v55 = vrot.slane %v1366_v33, %v4182_v15  ;;  %v1381_v0 = vrot.slane %v1367_v32, %v4182_v15  ;;  %v1390_v12 = vrot.slane %v1382_v2, %v4182_v15  ;;  %v1397_v13 = vrot.slane %v1383_v16, %v4182_v15 }
 0x36e   :  { %v1585_v40 = vrot.slane %v1571_v35, %v4182_v15 }
 0x36f   :  { %v1554_v20 = vcombine.low %v1374_v55, %v1390_v12  ;;  %v1562_v21 = vcombine.low %v1381_v0, %v1397_v13  ;;  %v3607_v22 = vcombine.high %v1374_v55, %v1390_v12  ;;  %v3608_v23 = vcombine.high %v1381_v0, %v1397_v13 }
 0x370   :  { %v3914_v42 = vpop.eup %3913 }
 0x371   :  { %v1561_v50 = vrot.slane %v1554_v20, %v4165_v62  ;;  %v1569_v51 = vrot.slane %v1562_v21, %v4165_v62  ;;  %v1697_v52 = vrot.slane %v3607_v22, %v4165_v62  ;;  %v1705_v14 = vrot.slane %v3608_v23, %v4165_v62  ;;  %v3916_v31 = vpop.eup %3915 }
 0x372   :  { %v2514_v29 = vpop.xlane.xlu0 %2513  ;;  %v2525_v45 = vmul.f32 %v3914_v42, %v4557_v26  ;;  %v2527_v39 = vmul.f32 %v3916_v31, %v4555_v7 }
 0x373   :  { %3919 = vrcp.f32 %v2514_v29  ;;  %v1586_v46 = vcombine.low %v1561_v50, %v1569_v51  ;;  %v1722_v53 = vcombine.low %v1697_v52, %v1705_v14  ;;  %v1587_v41 = vcombine.high %v1561_v50, %v1569_v51 }
 0x374   :  { %v1723_v2 = vcombine.high %v1697_v52, %v1705_v14 }
 0x375   :  { %v1594_v57 = vrot.slane %v1586_v46, %v4182_v15  ;;  %v4701_v59 = vrot.slane %v1722_v53, %v4182_v15  ;;  %v1601_v26 = vrot.slane %v1587_v41, %v4182_v15 }
 0x376   :  { %v2517_v61 = vpop.xlane.xlu0 %2516  ;;  %v1737_v55 = vrot.slane %v1723_v2, %v4182_v15 }
 0x377   :  { %v1602_v63 = vcombine.low %v1578_v56, %v1594_v57  ;;  %v1738_v3 = vcombine.low %v4698_v58, %v4701_v59  ;;  %v1603_v32 = vcombine.high %v1578_v56, %v1594_v57  ;;  %v3918_v16 = vpop.eup %3917  ;;  %v1604_v8 = vcombine.low %v1585_v40, %v1601_v26 }
 0x378   :  { %v1605_v17 = vcombine.high %v1585_v40, %v1601_v26 }
 0x379   :  { %3821 = vmatpush3.msra.mxu1 %v1602_v63  ;;  %3849 = vmatpush3.msra.mxu0 %v1738_v3 }
 0x37a   :  { %v2520_v33 = vpop.xlane.xlu0 %2519  ;;  %3823 = vmatmul.mubr.msk.f32.vlgmr.msra.gmra.mxu1 %vm2451_vm3, %v2525_v45  ;;  %3825 = vmatprep.subr.mxu1 %v3961_v49 }
 0x37b   :  { %3921 = vrcp.f32 %v2520_v33  ;;  %3826 = vmatpush3.msra.mxu1 %v1671_v37  ;;  %3829 = vmatprep.mubr.msk.f32.mxu1 %vm3962_vm1, %v3961_v49  ;;  %v2529_v37 = vmul.f32 %v3918_v16, %v4563_v19 }
 0x37c   :  { %3827 = vmatprep.subr.mxu1 %v3961_v49  ;;  %3860 = vmatprep.subr.mxu0 %v3961_v49 }
 0x37d   :  { %3828 = vmatpush3.msra.mxu1 %v1603_v32 }
 0x37e   :  { %3830 = vmatmul.mubr.msk.f32.vlgmr.msra.gmra.mxu1 %vm2451_vm3, %v2527_v39  ;;  %3832 = vmatprep.subr.mxu1 %v3961_v49 }
 0x37f   :  { %3833 = vmatpush3.msra.mxu1 %v1672_v28  ;;  %3836 = vmatprep.mubr.msk.f32.mxu1 %vm3962_vm1, %v3961_v49  ;;  %v1721_v28 = vrot.slane %v1707_v44, %v4182_v15 }
 0x380   :  { %v3920_v7 = vpop.eup %3919  ;;  %3834 = vmatprep.subr.mxu1 %v3961_v49 }
 0x381   :  { %3835 = vmatpush3.msra.mxu1 %v1604_v8  ;;  %v2533_v0 = vmul.f32 %v3920_v7, %v4569_v47  ;;  %v1740_v19 = vcombine.low %v1721_v28, %v1737_v55  ;;  %v1741_v4 = vcombine.high %v1721_v28, %v1737_v55 }
 0x382   :  { %3837 = vmatmul.mubr.msk.f32.vlgmr.msra.gmra.mxu1 %vm2451_vm3, %v2529_v37  ;;  %3839 = vmatprep.subr.mxu1 %v3961_v49 }
 0x383   :  { %3851 = vmatmul.mubr.msk.f32.vlgmr.msra.gmra.mxu0 %vm2451_vm3, %v2533_v0  ;;  %3840 = vmatpush3.msra.mxu1 %v1673_v36 }
 0x384   :  { %3861 = vmatpush3.msra.mxu0 %v1808_v34  ;;  %3841 = vmatprep.subr.mxu1 %v3961_v49  ;;  %v2523_v34 = vpop.xlane.xlu0 %2522 }
 0x385   :  { %3862 = vmatprep.subr.mxu0 %v3961_v49  ;;  %3842 = vmatpush3.msra.mxu1 %v1605_v17 }
 0x386   :  { %3863 = vmatpush3.msra.mxu0 %v1740_v19  ;;  %3864 = vmatprep.mubr.msk.f32.mxu0 %vm3962_vm1, %v3961_v49 }
 0x387   :  { %3843 = vmatprep.mubr.msk.f32.mxu1 %vm3962_vm1, %v3961_v49  ;;  %3853 = vmatprep.subr.mxu1 %v3961_v49 }
 0x388   :  { %v3922_v47 = vpop.eup %3921 }
 0x389   :  { %v2537_v9 = vmul.f32 %v3922_v47, %v4590_v5  ;;  %v1739_v5 = vcombine.high %v4698_v58, %v4701_v59 }
 0x38b   :  { %3865 = vmatmul.mubr.msk.f32.vlgmr.msra.gmra.mxu0 %vm2451_vm3, %v2537_v9 }
 0x397   :  { %v2511_v11 = vpop.xlane.xlu1 %2510 }
 0x398   :  { %3923 = vrcp.f32 %v2511_v11 }
 0x399   :  { %3925 = vrcp.f32 %v2517_v61 }
 0x39a   :  { %3927 = vrcp.f32 %v2523_v34 }
 0x3a5   :  { %v3924_v36 = vpop.eup %3923 }
 0x3a6   :  { %v2531_v54 = vmul.f32 %v3924_v36, %v4657_v6  ;;  %v3926_v12 = vpop.eup %3925 }
 0x3a7   :  { %v2535_v13 = vmul.f32 %v3926_v12, %v4577_v60  ;;  %v3928_v18 = vpop.eup %3927 }
 0x3a8   :  { %3844 = vmatmul.mubr.msk.f32.vlgmr.msra.gmra.mxu1 %vm2451_vm3, %v2531_v54  ;;  %v2539_v10 = vmul.f32 %v3928_v18, %v4596_v1 }
 0x3a9   :  { %3854 = vmatpush3.msra.mxu1 %v1807_v43  ;;  %3857 = vmatprep.mubr.msk.f32.mxu1 %vm3962_vm1, %v3961_v49 }
 0x3aa   :  { %3855 = vmatprep.subr.mxu1 %v3961_v49 }
 0x3ab   :  { %3856 = vmatpush3.msra.mxu1 %v1739_v5 }
 0x3ac   :  { %3867 = vmatprep.subr.mxu1 %v3961_v49  ;;  %3858 = vmatmul.mubr.msk.f32.vlgmr.msra.gmra.mxu1 %vm2451_vm3, %v2535_v13 }
 0x3ad   :  { %3868 = vmatpush3.msra.mxu1 %v1809_v25  ;;  %3871 = vmatprep.mubr.msk.f32.mxu1 %vm3962_vm1, %v3961_v49 }
 0x3ae   :  { %3869 = vmatprep.subr.mxu1 %v3961_v49 }
 0x3af   :  { %3870 = vmatpush3.msra.mxu1 %v1741_v4 }
 0x3b0   :  { %3872 = vmatmul.mubr.msk.f32.vlgmr.msra.gmra.mxu1 %vm2451_vm3, %v2539_v10 }
 0x43a   :  { %v2609_v60 = vpop.f32.mrf.mxu1 }
 0x43c   :  { %v3824_v43 = vpop.f32.mrf.mxu1 }
 0x43e   :  { %v2682_v6 = vpop.f32.mrf.mxu1 }
 0x440   :  { %v3831_v20 = vpop.f32.mrf.mxu1 }
 0x442   :  { %v2755_v21 = vpop.f32.mrf.mxu1 }
 0x443   :  { %v2901_v22 = vpop.f32.mrf.mxu0  ;;  %v3124_v24 = vcombine.low %v2609_v60, %v2755_v21  ;;  %v3125_v48 = vcombine.high %v2609_v60, %v2755_v21 }
 0x444   :  { %v3838_v23 = vpop.f32.mrf.mxu1 }
 0x445   :  { %v3852_v38 = vpop.f32.mrf.mxu0  ;;  %v3132_v1 = vrot.slane %v3124_v24, %v4165_v62  ;;  %v3139_v29 = vrot.slane %v3125_v48, %v4165_v62 }
 0x44b   :  { %v3047_v30 = vpop.f32.mrf.mxu0 }
 0x44c   :  { %v3192_v63 = vcombine.low %v2901_v22, %v3047_v30  ;;  %v3193_v3 = vcombine.high %v2901_v22, %v3047_v30  ;;  %v3582_v30 = vld [vmem:[%s4857_s4 + $0x78] sm:$0xff] }
 0x44d   :  { %v3866_v25 = vpop.f32.mrf.mxu0  ;;  %3874 = vmatprep.subr.mxu0 %v3582_v30 }
 0x44e   :  { %v3200_v2 = vrot.slane %v3192_v63, %v4165_v62  ;;  %v3207_v16 = vrot.slane %v3193_v3, %v4165_v62  ;;  %3875 = vmatpush3.msra.mxu0 %v3582_v30 }
 0x468   :  { %v2828_v50 = vpop.f32.mrf.mxu1 }
 0x469   :  { %v3140_v51 = vcombine.low %v2682_v6, %v2828_v50  ;;  %v3141_v52 = vcombine.high %v2682_v6, %v2828_v50 }
 0x46a   :  { %v3845_v14 = vpop.f32.mrf.mxu1 }
 0x46b   :  { %v3148_v46 = vrot.slane %v3140_v51, %v4165_v62  ;;  %v3155_v53 = vrot.slane %v3141_v52, %v4165_v62 }
 0x46c   :  { %v2974_v42 = vpop.f32.mrf.mxu1 }
 0x46d   :  { %v3156_v56 = vcombine.low %v3132_v1, %v3148_v46  ;;  %v3157_v57 = vcombine.high %v3132_v1, %v3148_v46  ;;  %v3172_v58 = vcombine.low %v3139_v29, %v3155_v53  ;;  %v3173_v59 = vcombine.high %v3139_v29, %v3155_v53 }
 0x46e   :  { %v3859_v61 = vpop.f32.mrf.mxu1 }
 0x46f   :  { %v3164_v45 = vrot.slane %v3156_v56, %v4182_v15  ;;  %v3171_v31 = vrot.slane %v3157_v57, %v4182_v15  ;;  %v3180_v35 = vrot.slane %v3172_v58, %v4182_v15  ;;  %v3187_v33 = vrot.slane %v3173_v59, %v4182_v15  ;;  %v3580_v59 = vld [vmem:[%s4857_s4 + $0x68] sm:$0xff] }
 0x470   :  { %v3120_v41 = vpop.f32.mrf.mxu1 }
 0x471   :  { %v3208_v32 = vcombine.low %v2974_v42, %v3120_v41  ;;  %v3209_v26 = vcombine.high %v2974_v42, %v3120_v41  ;;  %v3188_v8 = vcombine.high %v3164_v45, %v3961_v49  ;;  %v3189_v7 = vcombine.high %v3171_v31, %v3961_v49 }
 0x472   :  { %v3873_v39 = vpop.f32.mrf.mxu1  ;;  %v3190_v37 = vcombine.high %v3180_v35, %v3961_v49  ;;  %v3191_v55 = vcombine.high %v3187_v33, %v3961_v49 }
 0x473   :  { %v3216_v40 = vrot.slane %v3208_v32, %v4165_v62  ;;  %v3223_v44 = vrot.slane %v3209_v26, %v4165_v62  ;;  %v3260_v36 = vcombine.low %v3164_v45, %v3188_v8  ;;  %v3276_v54 = vcombine.low %v3171_v31, %v3189_v7  ;;  %v3579_v32 = vld [vmem:[%s4857_s4 + $0x60] sm:$0xff] }
 0x474   :  { %v3328_v12 = vcombine.low %v3180_v35, %v3190_v37  ;;  %v3344_v5 = vcombine.low %v3187_v33, %v3191_v55 }
 0x475   :  { %v3224_v0 = vcombine.low %v3200_v2, %v3216_v40  ;;  %v3225_v28 = vcombine.high %v3200_v2, %v3216_v40  ;;  %v3240_v17 = vcombine.low %v3207_v16, %v3223_v44  ;;  %v3241_v19 = vcombine.high %v3207_v16, %v3223_v44 }
 0x476   :  { %v3335_v21 = vrot.slane %v3328_v12, %v4165_v62  ;;  %v3351_v22 = vrot.slane %v3344_v5, %v4165_v62  ;;  %v3267_v23 = vrot.slane %v3260_v36, %v4165_v62  ;;  %v3283_v38 = vrot.slane %v3276_v54, %v4165_v62 }
 0x477   :  { %v3232_v47 = vrot.slane %v3224_v0, %v4182_v15  ;;  %v3239_v9 = vrot.slane %v3225_v28, %v4182_v15  ;;  %v3248_v11 = vrot.slane %v3240_v17, %v4182_v15  ;;  %v3255_v34 = vrot.slane %v3241_v19, %v4182_v15 }
 0x479   :  { %v3256_v13 = vcombine.high %v3232_v47, %v3961_v49  ;;  %v3257_v18 = vcombine.high %v3239_v9, %v3961_v49  ;;  %v3258_v4 = vcombine.high %v3248_v11, %v3961_v49  ;;  %v3259_v10 = vcombine.high %v3255_v34, %v3961_v49 }
 0x47b   :  { %v3268_v60 = vcombine.low %v3232_v47, %v3256_v13  ;;  %v3284_v43 = vcombine.low %v3239_v9, %v3257_v18  ;;  %v3336_v6 = vcombine.low %v3248_v11, %v3258_v4  ;;  %v3352_v20 = vcombine.low %v3255_v34, %v3259_v10  ;;  %v3933_v11 = vld [vmem:[%s4858_s5] sm:$0x3f]  ;;  %v3934_v13 = vld [vmem:[%s4853_s0 + $0x8] sm:$0xff] }
 0x47c   :  { %v3429_v9 = vsub.s32 3, %v4081_v27  ;;  %v3935_v10 = vld [vmem:[%s4853_s0] sm:$0xff]  ;;  %s3968_s0 = smov [#allocation2]  }
 0x47d   :  { %v3343_v25 = vrot.slane %v3336_v6, %v4165_v62  ;;  %v3359_v49 = vrot.slane %v3352_v20, %v4165_v62  ;;  %v3275_v24 = vrot.slane %v3268_v60, %v4165_v62  ;;  %v3291_v48 = vrot.slane %v3284_v43, %v4165_v62  ;;  %v3581_v62 = vld [vmem:[%s4857_s4 + $0x70] sm:$0xff]  ;;  %s3560_s5 = sshll.u32 %s3968_s0, 4  ;;  %s3561_s5 = int_to_ptr.vmem [resolvable:$true] %s3560_s5 }
 0x47e   :  { %3876 = vmatprep.subr.mxu0 %v3581_v62  ;;  %v3430_v34 = vrot.slane %v3933_v11, %v3429_v9  ;;  %s3936_s12 = scalar_lea.vmem %s3561_s5, 256  ;;  %p3941_p1 = scmp.lt.s32.totalorder %s3561_s5, %s3561_s5 }
 0x47f   :  { %v3360_v50 = vcombine.low %v3335_v21, %v3343_v25  ;;  %v3376_v51 = vcombine.low %v3351_v22, %v3359_v49  ;;  %v3292_v52 = vcombine.low %v3267_v23, %v3275_v24  ;;  %v3308_v14 = vcombine.low %v3283_v38, %v3291_v48  ;;  %3877 = vmatpush3.msra.mxu0 %v3581_v62  ;;  %p3937_p0 = scmp.ne.s32.totalorder %s3561_s5, %s3936_s12  ;;  %p3942_p2 = scmp.lt.s32.totalorder %s3936_s12, %s3936_s12 }
 0x480   :  { %v3361_v1 = vcombine.high %v3335_v21, %v3343_v25  ;;  %v3377_v29 = vcombine.high %v3351_v22, %v3359_v49  ;;  %v3293_v46 = vcombine.high %v3267_v23, %v3275_v24  ;;  %v3309_v53 = vcombine.high %v3283_v38, %v3291_v48  ;;  %3878 = vmatprep.subr.mxu0 %v3580_v59 }
 0x481   :  { %v3368_v42 = vrot.slane %v3360_v50, %v4182_v15  ;;  %v3384_v56 = vrot.slane %v3376_v51, %v4182_v15  ;;  %v3300_v57 = vrot.slane %v3292_v52, %v4182_v15  ;;  %v3316_v58 = vrot.slane %v3308_v14, %v4182_v15  ;;  %3879 = vmatpush3.msra.mxu0 %v3580_v59  ;;  %p3943_p3 = por %p3942_p2, %p3941_p1 }
 0x482   :  { %v3375_v61 = vrot.slane %v3361_v1, %v4182_v15  ;;  %v3391_v63 = vrot.slane %v3377_v29, %v4182_v15  ;;  %v3307_v3 = vrot.slane %v3293_v46, %v4182_v15  ;;  %v3323_v41 = vrot.slane %v3309_v53, %v4182_v15  ;;  %3880 = vmatprep.subr.mxu0 %v3579_v32 }
 0x483   :  { %v3393_v45 = vcombine.high %v3368_v42, %v3384_v56  ;;  %v3325_v31 = vcombine.high %v3300_v57, %v3316_v58  ;;  %v3392_v35 = vcombine.low %v3368_v42, %v3384_v56  ;;  %v3324_v33 = vcombine.low %v3300_v57, %v3316_v58  ;;  %3881 = vmatpush3.msra.mxu0 %v3579_v32  ;;  %p3944_p4 = pnand %p3943_p3, %p3937_p0 }
 0x484   :  { %v3395_v26 = vcombine.high %v3375_v61, %v3391_v63  ;;  %v3326_v39 = vcombine.low %v3307_v3, %v3323_v41  ;;  %v3394_v15 = vcombine.low %v3375_v61, %v3391_v63  ;;  %v3327_v2 = vcombine.high %v3307_v3, %v3323_v41 }
 0x485   :  { %3400 = vrot.lane.b32.xlu1 %v3393_v45, %s3965_s7  ;;  %3398 = vrot.lane.b32.xlu0 %v3325_v31, %s3965_s7  ;;  %v3543_v29 = vsub.s32 4, %v4081_v27  ;;  %v3549_v46 = vsub.s32 5, %v4081_v27 }
 0x487   :  { %v3544_v53 = vrot.slane %v3933_v11, %v3543_v29  ;;  %v3550_v57 = vrot.slane %v3933_v11, %v3549_v46 }
 0x489   :  { %3416 = vrot.lane.b32.xlu1 %v3395_v26, %s3966_s8  ;;  %3406 = vrot.lane.b32.xlu0 %v3326_v39, %s3967_s9 }
 0x48d   :  { %3408 = vrot.lane.b32.xlu0 %v3394_v15, %s3967_s9 }
 0x491   :  { %3414 = vrot.lane.b32.xlu0 %v3327_v2, %s3966_s8 }
 0x4f7   :  { %v3399_v16 = vpop.permute.xlu0 %3398  ;;  %v3401_v44 = vpop.permute.xlu1 %3400 }
 0x4f8   :  { %v3421_v7 = vsel %vm1810_vm2, %v3392_v35, %v3401_v44  ;;  %v3420_v37 = vsel %vm1810_vm2, %v3324_v33, %v3399_v16 }
 0x4fb   :  { %v3407_v40 = vpop.permute.xlu0 %3406  ;;  %v3417_v17 = vpop.permute.xlu1 %3416 }
 0x4fc   :  { %v3422_v0 = vsel %vm2451_vm3, %v3420_v37, %v3407_v40 }
 0x4ff   :  { %v3409_v8 = vpop.permute.xlu0 %3408 }
 0x500   :  { %v3423_v55 = vsel %vm2451_vm3, %v3421_v7, %v3409_v8 }
 0x501   :  { %v3426_v47 = vsel %vm3424_vm4, %v3423_v55, %v3417_v17 }
 0x503   :  { %v3415_v28 = vpop.permute.xlu0 %3414 }
 0x504   :  { %v3425_v19 = vsel %vm3424_vm4, %v3422_v0, %v3415_v28 }
 0x505   :  { %3882 = vmatprep.mubr.msk.f32.mxu0 %vm66_vm0, %v3425_v19 }
 0x506   :  { %3883 = vmatmul.mubr.msk.f32.vlgmr.msra.gmra.mxu0 %vm66_vm0, %v3426_v47 }
 0x5c6   :  { %v3884_v36 = vpop.f32.mrf.mxu0 }
 0x5c7   :  { %v3509_v54 = vadd.f32 %v3884_v36, %v3430_v34 }
 0x5c8   :  { %v3503_v12 = vpop.f32.mrf.mxu0 }
 0x5c9   :  { %v3504_v5 = vadd.f32 %v3503_v12, %v3430_v34  ;;  %v3513_v18 = vadd.f32 %v3934_v13, %v3509_v54 }
 0x5cb   :  { %v3517_v4 = vsel %vm66_vm0, %v3513_v18, 0.0  ;;  %v3512_v60 = vadd.f32 %v3935_v10, %v3504_v5 }
 0x5cc   :  { %3518 = vadd.xlane.f32.xlu1 %v3517_v4 }
 0x5cd   :  { %v3514_v43 = vsel %vm66_vm0, %v3512_v60, 0.0 }
 0x5ce   :  { %3515 = vadd.xlane.f32.xlu0 %v3514_v43 }
 0x655   :  { %v3519_v6 = vpop.xlane.xlu1 %3518 }
 0x656   :  { %v3522_v20 = vmul.f32 0.03125, %v3519_v6 }
 0x657   :  { %v3516_v21 = vpop.xlane.xlu0 %3515 }
 0x658   :  { %v3521_v22 = vmul.f32 0.03125, %v3516_v21  ;;  %v3524_v23 = vsub.f32 %v3513_v18, %v3522_v20 }
 0x65a   :  { %v3523_v38 = vsub.f32 %v3512_v60, %v3521_v22  ;;  %v3526_v49 = vmul.f32 %v3524_v23, %v3524_v23 }
 0x65c   :  { %v3525_v30 = vmul.f32 %v3523_v38, %v3523_v38  ;;  %v3530_v24 = vsel %vm66_vm0, %v3526_v49, 0.0 }
 0x65e   :  { %v3527_v25 = vsel %vm66_vm0, %v3525_v30, 0.0 }
 0x65f   :  { %3528 = vadd.xlane.f32.xlu0 %v3527_v25 }
 0x663   :  { %3531 = vadd.xlane.f32.xlu0 %v3530_v24 }
 0x6e8   :  { %v3529_v48 = vpop.xlane.xlu0 %3528 }
 0x6e9   :  { %v3533_v50 = vmul.f32 0.03125, %v3529_v48 }
 0x6eb   :  { %v3535_v51 = vadd.f32 1e-05, %v3533_v50 }
 0x6ec   :  { %v3532_v52 = vpop.xlane.xlu0 %3531 }
 0x6ed   :  { %3929 = vrsqrt.f32 %v3535_v51  ;;  %v3534_v14 = vmul.f32 0.03125, %v3532_v52 }
 0x6ef   :  { %v3536_v1 = vadd.f32 1e-05, %v3534_v14 }
 0x6f1   :  { %3931 = vrsqrt.f32 %v3536_v1 }
 0x6fa   :  { %v3930_v42 = vpop.eup %3929 }
 0x6fb   :  { %v3539_v56 = vmul.f32 %v3930_v42, %v3523_v38 }
 0x6fd   :  { %v3545_v58 = vmul.f32 %v3544_v53, %v3539_v56 }
 0x6fe   :  { %v3932_v62 = vpop.eup %3931 }
 0x6ff   :  { %v3540_v59 = vmul.f32 %v3932_v62, %v3524_v23  ;;  %v3551_v61 = vadd.f32 %v3550_v57, %v3545_v58 }
 0x701   :  { %v3546_v63 = vmul.f32 %v3544_v53, %v3540_v59  ;;  %3553 = vst.msk [vmem:[#allocation2] sm:$0xff] %vm66_vm0, %v3551_v61 }
 0x703   :  { %v3552_v3 = vadd.f32 %v3550_v57, %v3546_v63 }
 0x705   :  { %3554 = vst.msk [vmem:[#allocation2 + $0x8] sm:$0xff] %vm66_vm0, %v3552_v3 }
 0x706   :  { %3947 = shalt.err (!%p3944_p4)
}
 0x707   :  { %s3969_s13 = smov 128  }
 0x708   :  { %3566 = dma.vmem_to_hbm [thread:$0]  %s3561_s5, 256, %s4859_s6, [#allocation3], %s3969_s13, %s3969_s13, %s3965_s7  }
 0x709   :  { %3956 = dma.done.wait [#allocation3], 256  }
 0x70a   :  { %3957 = vsyncadd [#allocation3], 4294967040 }
 0x70b   :  { %3570 = vsyncpa [#allocation3], 1 }

</bundles_post_ra>
